<compile_context>
chip_gen: v6e
topology: v6e:2x2x1
jax: 0.10.0
libtpu: 0.0.40
codegen_flags: <defaults>
</compile_context>

<pallas_src>
import functools

import jax
import jax.numpy as jnp
from jax import lax
from jax.experimental import pallas as pl
from jax.experimental.pallas import tpu as pltpu


# ----------------------------- Pallas kernel ----------------------------------

def _sa_kernel(w_ref, x_ref, o_ref, y_ref, *, ksize, th, pool_chunk, mul_chunk):
    """Fused SALayer.  Grid = (batch, H // th).

    w_ref : SMEM (2*k*k,) f32 -- Conv2d(2,1,k,bias=False) weight, (cin, kh, kw) order.
    x_ref : VMEM (C, H, W)    -- full feature map of one batch element (resident
                                 across all H-tile steps of that batch).
    o_ref : VMEM (C, th, W)   -- output tile for this (batch, h-tile) grid step.
    y_ref : VMEM (H, W) f32   -- spatial attention map; computed at ht == 0, reused
                                 by the remaining H tiles of the same batch.
    """
    C, H, W = x_ref.shape
    K = ksize
    P = K // 2
    ht = pl.program_id(1)

    # -------- attention map: channel pooling + 5x5 conv + sigmoid (once per batch) --
    @pl.when(ht == 0)
    def _compute_attention_map():
        # Channel max / mean pooling, `pool_chunk` channels (~32 vregs) per trip.
        x0 = x_ref[pl.ds(0, pool_chunk)].astype(jnp.float32)          # (pc, H, W)
        mx0 = jnp.max(x0, axis=0)
        sm0 = jnp.sum(x0, axis=0)

        def pool_body(i, carry):
            mx, sm = carry
            c0 = pl.multiple_of(i * pool_chunk, pool_chunk)
            xb = x_ref[pl.ds(c0, pool_chunk)].astype(jnp.float32)
            return jnp.maximum(mx, jnp.max(xb, axis=0)), sm + jnp.sum(xb, axis=0)

        mx, sm = lax.fori_loop(1, C // pool_chunk, pool_body, (mx0, sm0))
        av = sm * (1.0 / C)

        # 5x5 / 2-channel conv, SAME padding, kept off the MXU (K = 50 is tiny):
        #   y[i,j] = sum_{c,kh,kw} w[c,kh,kw] * p[c, i+kh-P, j+kw-P]  (zero outside)
        # W halo: one lane roll + edge mask per (c, kw != P)  -> 8 rolls total.
        # H halo: per-kh accumulators r[kh], combined with 4 sublane rolls at the end.
        col = lax.broadcasted_iota(jnp.int32, (H, W), 1)
        planes = (mx, av)
        r = [jnp.zeros((H, W), jnp.float32) for _ in range(K)]
        for kw in range(K):
            dw = kw - P
            if dw != 0:
                keep_w = jnp.logical_and(col + dw >= 0, col + dw < W)
            for c in range(2):
                s = planes[c]
                if dw != 0:
                    s = pltpu.roll(s, (-dw) % W, axis=1)       # lane rotate (XLU)
                    s = jnp.where(keep_w, s, 0.0)
                for kh in range(K):
                    r[kh] = r[kh] + w_ref[c * K * K + kh * K + kw] * s

        row = lax.broadcasted_iota(jnp.int32, (H, W), 0)
        acc = r[P]                                              # kh == P: no shift
        for kh in range(K):
            dh = kh - P
            if dh == 0:
                continue
            t = pltpu.roll(r[kh], (-dh) % H, axis=0)            # sublane rotate (XLU)
            keep_h = jnp.logical_and(row + dh >= 0, row + dh < H)
            acc = acc + jnp.where(keep_h, t, 0.0)

        # Sigmoid: exp(-x) saturates cleanly in f32 (no NaN path); exp -> EUP slot.
        y_ref[...] = 1.0 / (1.0 + jnp.exp(-acc))

    # -------- out tile = x tile * y tile, chunked over channels ---------------------
    row0 = pl.multiple_of(ht * th, th)
    y_tile = y_ref[pl.ds(row0, th), :]                          # (th, W)

    def mul_body(i, carry):
        c0 = pl.multiple_of(i * mul_chunk, mul_chunk)
        xb = x_ref[pl.ds(c0, mul_chunk), pl.ds(row0, th), :].astype(jnp.float32)
        o_ref[pl.ds(c0, mul_chunk)] = (xb * y_tile).astype(o_ref.dtype)
        return carry

    lax.fori_loop(0, C // mul_chunk, mul_body, 0)


# ----------------------------- wrapper ------------------------------------------

def _largest_divisor(n, cap):
    best = 1
    for cand in (2, 4, 8, 16, 32, 64):
        if cand <= cap and n % cand == 0:
            best = cand
    return best


def sa_layer(x, w):
    """SALayer forward.

    x: [B, C, H, W] feature map (f32 or bf16; math is done in f32).
    w: [1, 2, k, k] Conv2d(2, 1, k, stride=1, padding=(k-1)//2, bias=False) weight
       in PyTorch OIHW layout.
    """
    B, C, H, W = x.shape
    K = w.shape[-1]
    w_flat = w.reshape(-1).astype(jnp.float32)       # (2*k*k,), (cin, kh, kw) order

    # H tiling: several pipeline steps per batch so the output writeback DMA (and,
    # on v7x, each TensorCore's single-batch schedule) is not fully exposed.
    th = 8 if H % 8 == 0 else H
    n_ht = H // th
    pool_chunk = _largest_divisor(C, 8)                           # ~32 vregs / trip
    mul_chunk = _largest_divisor(C, max(1, 16384 // (th * W)))    # ~16 vregs / trip

    kernel = functools.partial(_sa_kernel, ksize=K, th=th,
                               pool_chunk=pool_chunk, mul_chunk=mul_chunk)
    return pl.pallas_call(
        kernel,
        out_shape=jax.ShapeDtypeStruct((B, C, H, W), x.dtype),
        grid=(B, n_ht),
        in_specs=[
            # Conv weight: 2*k*k scalars in SMEM (scalar load -> broadcast FMA).
            pl.BlockSpec(memory_space=pltpu.MemorySpace.SMEM),
            # Full feature map of one batch element; block index depends only on b,
            # so the HBM fetch happens once per batch and is reused by all H tiles.
            pl.BlockSpec((None, C, H, W), lambda b, h: (b, 0, 0, 0)),
        ],
        # Output streamed in lane-dense (C, th, W) tiles -> writeback pipelines.
        out_specs=pl.BlockSpec((None, C, th, W), lambda b, h: (b, 0, h, 0)),
        scratch_shapes=[pltpu.VMEM((H, W), jnp.float32)],         # attention map y
        compiler_params=pltpu.CompilerParams(
            dimension_semantics=("parallel", "arbitrary")),
    )(w_flat, x)


# ----------------------------- pure-JAX reference ------------------------------

def sa_layer_reference(x, w):
    mx = jnp.max(x, axis=1, keepdims=True)
    av = jnp.mean(x, axis=1, keepdims=True)
    cp = jnp.concatenate([mx, av], axis=1)                        # [B, 2, H, W]
    y = lax.conv_general_dilated(
        cp, w, window_strides=(1, 1), padding="SAME",
        dimension_numbers=("NCHW", "OIHW", "NCHW"),
        precision=lax.Precision.HIGHEST)
    return x * jax.nn.sigmoid(y)


# ----------------------------- main --------------------------------------------

if __name__ == "__main__":
    key = jax.random.PRNGKey(0)
    kx, kw = jax.random.split(key)

    # Small, TPU-friendly SALayer input: [B, C, H, W] with lane-dense W = 128.
    B, C, H, W = 2, 64, 32, 128
    x = jax.random.normal(kx, (B, C, H, W), jnp.float32)

    # Conv2d(2, 1, kernel_size=5, bias=False) weight, PyTorch OIHW layout.
    k = 5
    fan_in = 2 * k * k
    w = jax.random.normal(kw, (1, 2, k, k), jnp.float32) / jnp.sqrt(float(fan_in))

    fwd = jax.jit(sa_layer)
    out = jax.block_until_ready(fwd(x, w))
    assert out.shape == (B, C, H, W) and out.dtype == x.dtype

    ref = jax.block_until_ready(sa_layer_reference(x, w))
    max_err = float(jnp.max(jnp.abs(out - ref)))
    assert max_err < 1e-4, f"max abs error {max_err}"

    print("KERNEL_OK")
</pallas_src>

<mosaic_0001>
module attributes {stable_mosaic.version = 11 : i64} {
  func.func @_sa_kernel(%arg0: i32, %arg1: i32, %arg2: memref<50xf32, #tpu.memory_space<smem>>, %arg3: memref<1x64x32x128xf32, #tpu.memory_space<vmem>>, %arg4: memref<1x64x8x128xf32, #tpu.memory_space<vmem>>, %arg5: memref<32x128xf32, #tpu.memory_space<vmem>>) attributes {dimension_semantics = [#tpu.dimension_semantics<parallel>, #tpu.dimension_semantics<arbitrary>], iteration_bounds = array<i64: 2, 4>, scalar_prefetch = 0 : i64, scratch_operands = 1 : i64, tpu.core_type = #tpu.core_type<tc>, window_params = [{transform_indices = @transform_0, window_bounds = array<i64: 50>}, {transform_indices = @transform_1, window_bounds = array<i64: 1, 64, 32, 128>}, {transform_indices = @transform_2, window_bounds = array<i64: 1, 64, 8, 128>}]} {
    %c0_i32 = arith.constant 0 : i32
    %0 = arith.cmpi eq, %arg1, %c0_i32 : i32
    %1 = arith.extui %0 : i1 to i32
    %c0_i32_0 = arith.constant 0 : i32
    %2 = arith.cmpi ne, %1, %c0_i32_0 : i32
    scf.if %2 {
      %c0_3 = arith.constant 0 : index
      %c0_4 = arith.constant 0 : index
      %c0_5 = arith.constant 0 : index
      %c0_6 = arith.constant 0 : index
      %8 = vector.load %arg3[%c0_3, %c0_4, %c0_5, %c0_6] : memref<1x64x32x128xf32, #tpu.memory_space<vmem>>, vector<1x8x32x128xf32>
      %9 = vector.shape_cast %8 : vector<1x8x32x128xf32> to vector<8x32x128xf32>
      %cst = arith.constant dense<0xFF800000> : vector<32x128xf32>
      %10 = vector.multi_reduction <maximumf>, %9, %cst [0] : vector<8x32x128xf32> to vector<32x128xf32>
      %cst_7 = arith.constant dense<0.000000e+00> : vector<32x128xf32>
      %11 = vector.multi_reduction <add>, %9, %cst_7 [0] : vector<8x32x128xf32> to vector<32x128xf32>
      %c1_i32_8 = arith.constant 1 : i32
      %c7_i32 = arith.constant 7 : i32
      %12 = arith.addi %c1_i32_8, %c7_i32 : i32
      %c1_i32_9 = arith.constant 1 : i32
      %13:2 = scf.for %arg6 = %c1_i32_8 to %12 step %c1_i32_9 iter_args(%arg7 = %10, %arg8 = %11) -> (vector<32x128xf32>, vector<32x128xf32>)  : i32 {
        %c8_i32_70 = arith.constant 8 : i32
        %343 = arith.muli %arg6, %c8_i32_70 : i32
        %344 = tpu.assume_multiple %343, 8 : i32
        %c0_71 = arith.constant 0 : index
        %345 = arith.index_cast %344 : i32 to index
        %c0_72 = arith.constant 0 : index
        %c0_73 = arith.constant 0 : index
        %346 = vector.load %arg3[%c0_71, %345, %c0_72, %c0_73] : memref<1x64x32x128xf32, #tpu.memory_space<vmem>>, vector<1x8x32x128xf32>
        %347 = vector.shape_cast %346 : vector<1x8x32x128xf32> to vector<8x32x128xf32>
        %cst_74 = arith.constant dense<0xFF800000> : vector<32x128xf32>
        %348 = vector.multi_reduction <maximumf>, %347, %cst_74 [0] : vector<8x32x128xf32> to vector<32x128xf32>
        %349 = arith.maximumf %arg7, %348 : vector<32x128xf32>
        %cst_75 = arith.constant dense<0.000000e+00> : vector<32x128xf32>
        %350 = vector.multi_reduction <add>, %347, %cst_75 [0] : vector<8x32x128xf32> to vector<32x128xf32>
        %351 = arith.addf %arg8, %350 : vector<32x128xf32>
        scf.yield %349, %351 : vector<32x128xf32>, vector<32x128xf32>
      }
      %c7_i32_10 = arith.constant 7 : i32
      %cst_11 = arith.constant 1.562500e-02 : f32
      %14 = vector.broadcast %cst_11 : f32 to vector<32x128xf32>
      %15 = arith.mulf %13#1, %14 : vector<32x128xf32>
      %16 = tpu.iota {dimensions = array<i32: 1>} : vector<32x128xi32>
      %cst_12 = arith.constant 0.000000e+00 : f32
      %17 = vector.broadcast %cst_12 : f32 to vector<32x128xf32>
      %cst_13 = arith.constant 0.000000e+00 : f32
      %18 = vector.broadcast %cst_13 : f32 to vector<32x128xf32>
      %cst_14 = arith.constant 0.000000e+00 : f32
      %19 = vector.broadcast %cst_14 : f32 to vector<32x128xf32>
      %cst_15 = arith.constant 0.000000e+00 : f32
      %20 = vector.broadcast %cst_15 : f32 to vector<32x128xf32>
      %cst_16 = arith.constant 0.000000e+00 : f32
      %21 = vector.broadcast %cst_16 : f32 to vector<32x128xf32>
      %c-2_i32 = arith.constant -2 : i32
      %22 = vector.broadcast %c-2_i32 : i32 to vector<32x128xi32>
      %23 = arith.addi %16, %22 : vector<32x128xi32>
      %c0_i32_17 = arith.constant 0 : i32
      %24 = vector.broadcast %c0_i32_17 : i32 to vector<32x128xi32>
      %25 = arith.cmpi sge, %23, %24 : vector<32x128xi32>
      %c-2_i32_18 = arith.constant -2 : i32
      %26 = vector.broadcast %c-2_i32_18 : i32 to vector<32x128xi32>
      %27 = arith.addi %16, %26 : vector<32x128xi32>
      %c128_i32 = arith.constant 128 : i32
      %28 = vector.broadcast %c128_i32 : i32 to vector<32x128xi32>
      %29 = arith.cmpi slt, %27, %28 : vector<32x128xi32>
      %30 = arith.andi %25, %29 : vector<32x128xi1>
      %c2_i32 = arith.constant 2 : i32
      %31 = tpu.dynamic_rotate %13#0 by %c2_i32 dim 1 : vector<32x128xf32>, i32 -> vector<32x128xf32>
      %cst_19 = arith.constant 0.000000e+00 : f32
      %32 = vector.broadcast %cst_19 : f32 to vector<32x128xf32>
      %33 = arith.select %30, %31, %32 : vector<32x128xi1>, vector<32x128xf32>
      %c0_20 = arith.constant 0 : index
      %34 = memref.load %arg2[%c0_20] : memref<50xf32, #tpu.memory_space<smem>>
      %35 = vector.broadcast %34 : f32 to vector<32x128xf32>
      %36 = arith.mulf %35, %33 : vector<32x128xf32>
      %37 = arith.addf %17, %36 : vector<32x128xf32>
      %c5 = arith.constant 5 : index
      %38 = memref.load %arg2[%c5] : memref<50xf32, #tpu.memory_space<smem>>
      %39 = vector.broadcast %38 : f32 to vector<32x128xf32>
      %40 = arith.mulf %39, %33 : vector<32x128xf32>
      %41 = arith.addf %18, %40 : vector<32x128xf32>
      %c10 = arith.constant 10 : index
      %42 = memref.load %arg2[%c10] : memref<50xf32, #tpu.memory_space<smem>>
      %43 = vector.broadcast %42 : f32 to vector<32x128xf32>
      %44 = arith.mulf %43, %33 : vector<32x128xf32>
      %45 = arith.addf %19, %44 : vector<32x128xf32>
      %c15 = arith.constant 15 : index
      %46 = memref.load %arg2[%c15] : memref<50xf32, #tpu.memory_space<smem>>
      %47 = vector.broadcast %46 : f32 to vector<32x128xf32>
      %48 = arith.mulf %47, %33 : vector<32x128xf32>
      %49 = arith.addf %20, %48 : vector<32x128xf32>
      %c20 = arith.constant 20 : index
      %50 = memref.load %arg2[%c20] : memref<50xf32, #tpu.memory_space<smem>>
      %51 = vector.broadcast %50 : f32 to vector<32x128xf32>
      %52 = arith.mulf %51, %33 : vector<32x128xf32>
      %53 = arith.addf %21, %52 : vector<32x128xf32>
      %c2_i32_21 = arith.constant 2 : i32
      %54 = tpu.dynamic_rotate %15 by %c2_i32_21 dim 1 : vector<32x128xf32>, i32 -> vector<32x128xf32>
      %cst_22 = arith.constant 0.000000e+00 : f32
      %55 = vector.broadcast %cst_22 : f32 to vector<32x128xf32>
      %56 = arith.select %30, %54, %55 : vector<32x128xi1>, vector<32x128xf32>
      %c25 = arith.constant 25 : index
      %57 = memref.load %arg2[%c25] : memref<50xf32, #tpu.memory_space<smem>>
      %58 = vector.broadcast %57 : f32 to vector<32x128xf32>
      %59 = arith.mulf %58, %56 : vector<32x128xf32>
      %60 = arith.addf %37, %59 : vector<32x128xf32>
      %c30 = arith.constant 30 : index
      %61 = memref.load %arg2[%c30] : memref<50xf32, #tpu.memory_space<smem>>
      %62 = vector.broadcast %61 : f32 to vector<32x128xf32>
      %63 = arith.mulf %62, %56 : vector<32x128xf32>
      %64 = arith.addf %41, %63 : vector<32x128xf32>
      %c35 = arith.constant 35 : index
      %65 = memref.load %arg2[%c35] : memref<50xf32, #tpu.memory_space<smem>>
      %66 = vector.broadcast %65 : f32 to vector<32x128xf32>
      %67 = arith.mulf %66, %56 : vector<32x128xf32>
      %68 = arith.addf %45, %67 : vector<32x128xf32>
      %c40 = arith.constant 40 : index
      %69 = memref.load %arg2[%c40] : memref<50xf32, #tpu.memory_space<smem>>
      %70 = vector.broadcast %69 : f32 to vector<32x128xf32>
      %71 = arith.mulf %70, %56 : vector<32x128xf32>
      %72 = arith.addf %49, %71 : vector<32x128xf32>
      %c45 = arith.constant 45 : index
      %73 = memref.load %arg2[%c45] : memref<50xf32, #tpu.memory_space<smem>>
      %74 = vector.broadcast %73 : f32 to vector<32x128xf32>
      %75 = arith.mulf %74, %56 : vector<32x128xf32>
      %76 = arith.addf %53, %75 : vector<32x128xf32>
      %c-1_i32 = arith.constant -1 : i32
      %77 = vector.broadcast %c-1_i32 : i32 to vector<32x128xi32>
      %78 = arith.addi %16, %77 : vector<32x128xi32>
      %c0_i32_23 = arith.constant 0 : i32
      %79 = vector.broadcast %c0_i32_23 : i32 to vector<32x128xi32>
      %80 = arith.cmpi sge, %78, %79 : vector<32x128xi32>
      %c-1_i32_24 = arith.constant -1 : i32
      %81 = vector.broadcast %c-1_i32_24 : i32 to vector<32x128xi32>
      %82 = arith.addi %16, %81 : vector<32x128xi32>
      %c128_i32_25 = arith.constant 128 : i32
      %83 = vector.broadcast %c128_i32_25 : i32 to vector<32x128xi32>
      %84 = arith.cmpi slt, %82, %83 : vector<32x128xi32>
      %85 = arith.andi %80, %84 : vector<32x128xi1>
      %c1_i32_26 = arith.constant 1 : i32
      %86 = tpu.dynamic_rotate %13#0 by %c1_i32_26 dim 1 : vector<32x128xf32>, i32 -> vector<32x128xf32>
      %cst_27 = arith.constant 0.000000e+00 : f32
      %87 = vector.broadcast %cst_27 : f32 to vector<32x128xf32>
      %88 = arith.select %85, %86, %87 : vector<32x128xi1>, vector<32x128xf32>
      %c1 = arith.constant 1 : index
      %89 = memref.load %arg2[%c1] : memref<50xf32, #tpu.memory_space<smem>>
      %90 = vector.broadcast %89 : f32 to vector<32x128xf32>
      %91 = arith.mulf %90, %88 : vector<32x128xf32>
      %92 = arith.addf %60, %91 : vector<32x128xf32>
      %c6 = arith.constant 6 : index
      %93 = memref.load %arg2[%c6] : memref<50xf32, #tpu.memory_space<smem>>
      %94 = vector.broadcast %93 : f32 to vector<32x128xf32>
      %95 = arith.mulf %94, %88 : vector<32x128xf32>
      %96 = arith.addf %64, %95 : vector<32x128xf32>
      %c11 = arith.constant 11 : index
      %97 = memref.load %arg2[%c11] : memref<50xf32, #tpu.memory_space<smem>>
      %98 = vector.broadcast %97 : f32 to vector<32x128xf32>
      %99 = arith.mulf %98, %88 : vector<32x128xf32>
      %100 = arith.addf %68, %99 : vector<32x128xf32>
      %c16 = arith.constant 16 : index
      %101 = memref.load %arg2[%c16] : memref<50xf32, #tpu.memory_space<smem>>
      %102 = vector.broadcast %101 : f32 to vector<32x128xf32>
      %103 = arith.mulf %102, %88 : vector<32x128xf32>
      %104 = arith.addf %72, %103 : vector<32x128xf32>
      %c21 = arith.constant 21 : index
      %105 = memref.load %arg2[%c21] : memref<50xf32, #tpu.memory_space<smem>>
      %106 = vector.broadcast %105 : f32 to vector<32x128xf32>
      %107 = arith.mulf %106, %88 : vector<32x128xf32>
      %108 = arith.addf %76, %107 : vector<32x128xf32>
      %c1_i32_28 = arith.constant 1 : i32
      %109 = tpu.dynamic_rotate %15 by %c1_i32_28 dim 1 : vector<32x128xf32>, i32 -> vector<32x128xf32>
      %cst_29 = arith.constant 0.000000e+00 : f32
      %110 = vector.broadcast %cst_29 : f32 to vector<32x128xf32>
      %111 = arith.select %85, %109, %110 : vector<32x128xi1>, vector<32x128xf32>
      %c26 = arith.constant 26 : index
      %112 = memref.load %arg2[%c26] : memref<50xf32, #tpu.memory_space<smem>>
      %113 = vector.broadcast %112 : f32 to vector<32x128xf32>
      %114 = arith.mulf %113, %111 : vector<32x128xf32>
      %115 = arith.addf %92, %114 : vector<32x128xf32>
      %c31 = arith.constant 31 : index
      %116 = memref.load %arg2[%c31] : memref<50xf32, #tpu.memory_space<smem>>
      %117 = vector.broadcast %116 : f32 to vector<32x128xf32>
      %118 = arith.mulf %117, %111 : vector<32x128xf32>
      %119 = arith.addf %96, %118 : vector<32x128xf32>
      %c36 = arith.constant 36 : index
      %120 = memref.load %arg2[%c36] : memref<50xf32, #tpu.memory_space<smem>>
      %121 = vector.broadcast %120 : f32 to vector<32x128xf32>
      %122 = arith.mulf %121, %111 : vector<32x128xf32>
      %123 = arith.addf %100, %122 : vector<32x128xf32>
      %c41 = arith.constant 41 : index
      %124 = memref.load %arg2[%c41] : memref<50xf32, #tpu.memory_space<smem>>
      %125 = vector.broadcast %124 : f32 to vector<32x128xf32>
      %126 = arith.mulf %125, %111 : vector<32x128xf32>
      %127 = arith.addf %104, %126 : vector<32x128xf32>
      %c46 = arith.constant 46 : index
      %128 = memref.load %arg2[%c46] : memref<50xf32, #tpu.memory_space<smem>>
      %129 = vector.broadcast %128 : f32 to vector<32x128xf32>
      %130 = arith.mulf %129, %111 : vector<32x128xf32>
      %131 = arith.addf %108, %130 : vector<32x128xf32>
      %c2 = arith.constant 2 : index
      %132 = memref.load %arg2[%c2] : memref<50xf32, #tpu.memory_space<smem>>
      %133 = vector.broadcast %132 : f32 to vector<32x128xf32>
      %134 = arith.mulf %133, %13#0 : vector<32x128xf32>
      %135 = arith.addf %115, %134 : vector<32x128xf32>
      %c7 = arith.constant 7 : index
      %136 = memref.load %arg2[%c7] : memref<50xf32, #tpu.memory_space<smem>>
      %137 = vector.broadcast %136 : f32 to vector<32x128xf32>
      %138 = arith.mulf %137, %13#0 : vector<32x128xf32>
      %139 = arith.addf %119, %138 : vector<32x128xf32>
      %c12 = arith.constant 12 : index
      %140 = memref.load %arg2[%c12] : memref<50xf32, #tpu.memory_space<smem>>
      %141 = vector.broadcast %140 : f32 to vector<32x128xf32>
      %142 = arith.mulf %141, %13#0 : vector<32x128xf32>
      %143 = arith.addf %123, %142 : vector<32x128xf32>
      %c17 = arith.constant 17 : index
      %144 = memref.load %arg2[%c17] : memref<50xf32, #tpu.memory_space<smem>>
      %145 = vector.broadcast %144 : f32 to vector<32x128xf32>
      %146 = arith.mulf %145, %13#0 : vector<32x128xf32>
      %147 = arith.addf %127, %146 : vector<32x128xf32>
      %c22 = arith.constant 22 : index
      %148 = memref.load %arg2[%c22] : memref<50xf32, #tpu.memory_space<smem>>
      %149 = vector.broadcast %148 : f32 to vector<32x128xf32>
      %150 = arith.mulf %149, %13#0 : vector<32x128xf32>
      %151 = arith.addf %131, %150 : vector<32x128xf32>
      %c27 = arith.constant 27 : index
      %152 = memref.load %arg2[%c27] : memref<50xf32, #tpu.memory_space<smem>>
      %153 = vector.broadcast %152 : f32 to vector<32x128xf32>
      %154 = arith.mulf %153, %15 : vector<32x128xf32>
      %155 = arith.addf %135, %154 : vector<32x128xf32>
      %c32 = arith.constant 32 : index
      %156 = memref.load %arg2[%c32] : memref<50xf32, #tpu.memory_space<smem>>
      %157 = vector.broadcast %156 : f32 to vector<32x128xf32>
      %158 = arith.mulf %157, %15 : vector<32x128xf32>
      %159 = arith.addf %139, %158 : vector<32x128xf32>
      %c37 = arith.constant 37 : index
      %160 = memref.load %arg2[%c37] : memref<50xf32, #tpu.memory_space<smem>>
      %161 = vector.broadcast %160 : f32 to vector<32x128xf32>
      %162 = arith.mulf %161, %15 : vector<32x128xf32>
      %163 = arith.addf %143, %162 : vector<32x128xf32>
      %c42 = arith.constant 42 : index
      %164 = memref.load %arg2[%c42] : memref<50xf32, #tpu.memory_space<smem>>
      %165 = vector.broadcast %164 : f32 to vector<32x128xf32>
      %166 = arith.mulf %165, %15 : vector<32x128xf32>
      %167 = arith.addf %147, %166 : vector<32x128xf32>
      %c47 = arith.constant 47 : index
      %168 = memref.load %arg2[%c47] : memref<50xf32, #tpu.memory_space<smem>>
      %169 = vector.broadcast %168 : f32 to vector<32x128xf32>
      %170 = arith.mulf %169, %15 : vector<32x128xf32>
      %171 = arith.addf %151, %170 : vector<32x128xf32>
      %c1_i32_30 = arith.constant 1 : i32
      %172 = vector.broadcast %c1_i32_30 : i32 to vector<32x128xi32>
      %173 = arith.addi %16, %172 : vector<32x128xi32>
      %c0_i32_31 = arith.constant 0 : i32
      %174 = vector.broadcast %c0_i32_31 : i32 to vector<32x128xi32>
      %175 = arith.cmpi sge, %173, %174 : vector<32x128xi32>
      %c1_i32_32 = arith.constant 1 : i32
      %176 = vector.broadcast %c1_i32_32 : i32 to vector<32x128xi32>
      %177 = arith.addi %16, %176 : vector<32x128xi32>
      %c128_i32_33 = arith.constant 128 : i32
      %178 = vector.broadcast %c128_i32_33 : i32 to vector<32x128xi32>
      %179 = arith.cmpi slt, %177, %178 : vector<32x128xi32>
      %180 = arith.andi %175, %179 : vector<32x128xi1>
      %c127_i32 = arith.constant 127 : i32
      %181 = tpu.dynamic_rotate %13#0 by %c127_i32 dim 1 : vector<32x128xf32>, i32 -> vector<32x128xf32>
      %cst_34 = arith.constant 0.000000e+00 : f32
      %182 = vector.broadcast %cst_34 : f32 to vector<32x128xf32>
      %183 = arith.select %180, %181, %182 : vector<32x128xi1>, vector<32x128xf32>
      %c3 = arith.constant 3 : index
      %184 = memref.load %arg2[%c3] : memref<50xf32, #tpu.memory_space<smem>>
      %185 = vector.broadcast %184 : f32 to vector<32x128xf32>
      %186 = arith.mulf %185, %183 : vector<32x128xf32>
      %187 = arith.addf %155, %186 : vector<32x128xf32>
      %c8 = arith.constant 8 : index
      %188 = memref.load %arg2[%c8] : memref<50xf32, #tpu.memory_space<smem>>
      %189 = vector.broadcast %188 : f32 to vector<32x128xf32>
      %190 = arith.mulf %189, %183 : vector<32x128xf32>
      %191 = arith.addf %159, %190 : vector<32x128xf32>
      %c13 = arith.constant 13 : index
      %192 = memref.load %arg2[%c13] : memref<50xf32, #tpu.memory_space<smem>>
      %193 = vector.broadcast %192 : f32 to vector<32x128xf32>
      %194 = arith.mulf %193, %183 : vector<32x128xf32>
      %195 = arith.addf %163, %194 : vector<32x128xf32>
      %c18 = arith.constant 18 : index
      %196 = memref.load %arg2[%c18] : memref<50xf32, #tpu.memory_space<smem>>
      %197 = vector.broadcast %196 : f32 to vector<32x128xf32>
      %198 = arith.mulf %197, %183 : vector<32x128xf32>
      %199 = arith.addf %167, %198 : vector<32x128xf32>
      %c23 = arith.constant 23 : index
      %200 = memref.load %arg2[%c23] : memref<50xf32, #tpu.memory_space<smem>>
      %201 = vector.broadcast %200 : f32 to vector<32x128xf32>
      %202 = arith.mulf %201, %183 : vector<32x128xf32>
      %203 = arith.addf %171, %202 : vector<32x128xf32>
      %c127_i32_35 = arith.constant 127 : i32
      %204 = tpu.dynamic_rotate %15 by %c127_i32_35 dim 1 : vector<32x128xf32>, i32 -> vector<32x128xf32>
      %cst_36 = arith.constant 0.000000e+00 : f32
      %205 = vector.broadcast %cst_36 : f32 to vector<32x128xf32>
      %206 = arith.select %180, %204, %205 : vector<32x128xi1>, vector<32x128xf32>
      %c28 = arith.constant 28 : index
      %207 = memref.load %arg2[%c28] : memref<50xf32, #tpu.memory_space<smem>>
      %208 = vector.broadcast %207 : f32 to vector<32x128xf32>
      %209 = arith.mulf %208, %206 : vector<32x128xf32>
      %210 = arith.addf %187, %209 : vector<32x128xf32>
      %c33 = arith.constant 33 : index
      %211 = memref.load %arg2[%c33] : memref<50xf32, #tpu.memory_space<smem>>
      %212 = vector.broadcast %211 : f32 to vector<32x128xf32>
      %213 = arith.mulf %212, %206 : vector<32x128xf32>
      %214 = arith.addf %191, %213 : vector<32x128xf32>
      %c38 = arith.constant 38 : index
      %215 = memref.load %arg2[%c38] : memref<50xf32, #tpu.memory_space<smem>>
      %216 = vector.broadcast %215 : f32 to vector<32x128xf32>
      %217 = arith.mulf %216, %206 : vector<32x128xf32>
      %218 = arith.addf %195, %217 : vector<32x128xf32>
      %c43 = arith.constant 43 : index
      %219 = memref.load %arg2[%c43] : memref<50xf32, #tpu.memory_space<smem>>
      %220 = vector.broadcast %219 : f32 to vector<32x128xf32>
      %221 = arith.mulf %220, %206 : vector<32x128xf32>
      %222 = arith.addf %199, %221 : vector<32x128xf32>
      %c48 = arith.constant 48 : index
      %223 = memref.load %arg2[%c48] : memref<50xf32, #tpu.memory_space<smem>>
      %224 = vector.broadcast %223 : f32 to vector<32x128xf32>
      %225 = arith.mulf %224, %206 : vector<32x128xf32>
      %226 = arith.addf %203, %225 : vector<32x128xf32>
      %c2_i32_37 = arith.constant 2 : i32
      %227 = vector.broadcast %c2_i32_37 : i32 to vector<32x128xi32>
      %228 = arith.addi %16, %227 : vector<32x128xi32>
      %c0_i32_38 = arith.constant 0 : i32
      %229 = vector.broadcast %c0_i32_38 : i32 to vector<32x128xi32>
      %230 = arith.cmpi sge, %228, %229 : vector<32x128xi32>
      %c2_i32_39 = arith.constant 2 : i32
      %231 = vector.broadcast %c2_i32_39 : i32 to vector<32x128xi32>
      %232 = arith.addi %16, %231 : vector<32x128xi32>
      %c128_i32_40 = arith.constant 128 : i32
      %233 = vector.broadcast %c128_i32_40 : i32 to vector<32x128xi32>
      %234 = arith.cmpi slt, %232, %233 : vector<32x128xi32>
      %235 = arith.andi %230, %234 : vector<32x128xi1>
      %c126_i32 = arith.constant 126 : i32
      %236 = tpu.dynamic_rotate %13#0 by %c126_i32 dim 1 : vector<32x128xf32>, i32 -> vector<32x128xf32>
      %cst_41 = arith.constant 0.000000e+00 : f32
      %237 = vector.broadcast %cst_41 : f32 to vector<32x128xf32>
      %238 = arith.select %235, %236, %237 : vector<32x128xi1>, vector<32x128xf32>
      %c4 = arith.constant 4 : index
      %239 = memref.load %arg2[%c4] : memref<50xf32, #tpu.memory_space<smem>>
      %240 = vector.broadcast %239 : f32 to vector<32x128xf32>
      %241 = arith.mulf %240, %238 : vector<32x128xf32>
      %242 = arith.addf %210, %241 : vector<32x128xf32>
      %c9 = arith.constant 9 : index
      %243 = memref.load %arg2[%c9] : memref<50xf32, #tpu.memory_space<smem>>
      %244 = vector.broadcast %243 : f32 to vector<32x128xf32>
      %245 = arith.mulf %244, %238 : vector<32x128xf32>
      %246 = arith.addf %214, %245 : vector<32x128xf32>
      %c14 = arith.constant 14 : index
      %247 = memref.load %arg2[%c14] : memref<50xf32, #tpu.memory_space<smem>>
      %248 = vector.broadcast %247 : f32 to vector<32x128xf32>
      %249 = arith.mulf %248, %238 : vector<32x128xf32>
      %250 = arith.addf %218, %249 : vector<32x128xf32>
      %c19 = arith.constant 19 : index
      %251 = memref.load %arg2[%c19] : memref<50xf32, #tpu.memory_space<smem>>
      %252 = vector.broadcast %251 : f32 to vector<32x128xf32>
      %253 = arith.mulf %252, %238 : vector<32x128xf32>
      %254 = arith.addf %222, %253 : vector<32x128xf32>
      %c24 = arith.constant 24 : index
      %255 = memref.load %arg2[%c24] : memref<50xf32, #tpu.memory_space<smem>>
      %256 = vector.broadcast %255 : f32 to vector<32x128xf32>
      %257 = arith.mulf %256, %238 : vector<32x128xf32>
      %258 = arith.addf %226, %257 : vector<32x128xf32>
      %c126_i32_42 = arith.constant 126 : i32
      %259 = tpu.dynamic_rotate %15 by %c126_i32_42 dim 1 : vector<32x128xf32>, i32 -> vector<32x128xf32>
      %cst_43 = arith.constant 0.000000e+00 : f32
      %260 = vector.broadcast %cst_43 : f32 to vector<32x128xf32>
      %261 = arith.select %235, %259, %260 : vector<32x128xi1>, vector<32x128xf32>
      %c29 = arith.constant 29 : index
      %262 = memref.load %arg2[%c29] : memref<50xf32, #tpu.memory_space<smem>>
      %263 = vector.broadcast %262 : f32 to vector<32x128xf32>
      %264 = arith.mulf %263, %261 : vector<32x128xf32>
      %265 = arith.addf %242, %264 : vector<32x128xf32>
      %c34 = arith.constant 34 : index
      %266 = memref.load %arg2[%c34] : memref<50xf32, #tpu.memory_space<smem>>
      %267 = vector.broadcast %266 : f32 to vector<32x128xf32>
      %268 = arith.mulf %267, %261 : vector<32x128xf32>
      %269 = arith.addf %246, %268 : vector<32x128xf32>
      %c39 = arith.constant 39 : index
      %270 = memref.load %arg2[%c39] : memref<50xf32, #tpu.memory_space<smem>>
      %271 = vector.broadcast %270 : f32 to vector<32x128xf32>
      %272 = arith.mulf %271, %261 : vector<32x128xf32>
      %273 = arith.addf %250, %272 : vector<32x128xf32>
      %c44 = arith.constant 44 : index
      %274 = memref.load %arg2[%c44] : memref<50xf32, #tpu.memory_space<smem>>
      %275 = vector.broadcast %274 : f32 to vector<32x128xf32>
      %276 = arith.mulf %275, %261 : vector<32x128xf32>
      %277 = arith.addf %254, %276 : vector<32x128xf32>
      %c49 = arith.constant 49 : index
      %278 = memref.load %arg2[%c49] : memref<50xf32, #tpu.memory_space<smem>>
      %279 = vector.broadcast %278 : f32 to vector<32x128xf32>
      %280 = arith.mulf %279, %261 : vector<32x128xf32>
      %281 = arith.addf %258, %280 : vector<32x128xf32>
      %282 = tpu.iota {dimensions = array<i32: 0>} : vector<32x128xi32>
      %c2_i32_44 = arith.constant 2 : i32
      %283 = tpu.dynamic_rotate %265 by %c2_i32_44 dim 0 : vector<32x128xf32>, i32 -> vector<32x128xf32>
      %c-2_i32_45 = arith.constant -2 : i32
      %284 = vector.broadcast %c-2_i32_45 : i32 to vector<32x128xi32>
      %285 = arith.addi %282, %284 : vector<32x128xi32>
      %c0_i32_46 = arith.constant 0 : i32
      %286 = vector.broadcast %c0_i32_46 : i32 to vector<32x128xi32>
      %287 = arith.cmpi sge, %285, %286 : vector<32x128xi32>
      %c-2_i32_47 = arith.constant -2 : i32
      %288 = vector.broadcast %c-2_i32_47 : i32 to vector<32x128xi32>
      %289 = arith.addi %282, %288 : vector<32x128xi32>
      %c32_i32 = arith.constant 32 : i32
      %290 = vector.broadcast %c32_i32 : i32 to vector<32x128xi32>
      %291 = arith.cmpi slt, %289, %290 : vector<32x128xi32>
      %292 = arith.andi %287, %291 : vector<32x128xi1>
      %cst_48 = arith.constant 0.000000e+00 : f32
      %293 = vector.broadcast %cst_48 : f32 to vector<32x128xf32>
      %294 = arith.select %292, %283, %293 : vector<32x128xi1>, vector<32x128xf32>
      %295 = arith.addf %273, %294 : vector<32x128xf32>
      %c1_i32_49 = arith.constant 1 : i32
      %296 = tpu.dynamic_rotate %269 by %c1_i32_49 dim 0 : vector<32x128xf32>, i32 -> vector<32x128xf32>
      %c-1_i32_50 = arith.constant -1 : i32
      %297 = vector.broadcast %c-1_i32_50 : i32 to vector<32x128xi32>
      %298 = arith.addi %282, %297 : vector<32x128xi32>
      %c0_i32_51 = arith.constant 0 : i32
      %299 = vector.broadcast %c0_i32_51 : i32 to vector<32x128xi32>
      %300 = arith.cmpi sge, %298, %299 : vector<32x128xi32>
      %c-1_i32_52 = arith.constant -1 : i32
      %301 = vector.broadcast %c-1_i32_52 : i32 to vector<32x128xi32>
      %302 = arith.addi %282, %301 : vector<32x128xi32>
      %c32_i32_53 = arith.constant 32 : i32
      %303 = vector.broadcast %c32_i32_53 : i32 to vector<32x128xi32>
      %304 = arith.cmpi slt, %302, %303 : vector<32x128xi32>
      %305 = arith.andi %300, %304 : vector<32x128xi1>
      %cst_54 = arith.constant 0.000000e+00 : f32
      %306 = vector.broadcast %cst_54 : f32 to vector<32x128xf32>
      %307 = arith.select %305, %296, %306 : vector<32x128xi1>, vector<32x128xf32>
      %308 = arith.addf %295, %307 : vector<32x128xf32>
      %c31_i32 = arith.constant 31 : i32
      %309 = tpu.dynamic_rotate %277 by %c31_i32 dim 0 : vector<32x128xf32>, i32 -> vector<32x128xf32>
      %c1_i32_55 = arith.constant 1 : i32
      %310 = vector.broadcast %c1_i32_55 : i32 to vector<32x128xi32>
      %311 = arith.addi %282, %310 : vector<32x128xi32>
      %c0_i32_56 = arith.constant 0 : i32
      %312 = vector.broadcast %c0_i32_56 : i32 to vector<32x128xi32>
      %313 = arith.cmpi sge, %311, %312 : vector<32x128xi32>
      %c1_i32_57 = arith.constant 1 : i32
      %314 = vector.broadcast %c1_i32_57 : i32 to vector<32x128xi32>
      %315 = arith.addi %282, %314 : vector<32x128xi32>
      %c32_i32_58 = arith.constant 32 : i32
      %316 = vector.broadcast %c32_i32_58 : i32 to vector<32x128xi32>
      %317 = arith.cmpi slt, %315, %316 : vector<32x128xi32>
      %318 = arith.andi %313, %317 : vector<32x128xi1>
      %cst_59 = arith.constant 0.000000e+00 : f32
      %319 = vector.broadcast %cst_59 : f32 to vector<32x128xf32>
      %320 = arith.select %318, %309, %319 : vector<32x128xi1>, vector<32x128xf32>
      %321 = arith.addf %308, %320 : vector<32x128xf32>
      %c30_i32 = arith.constant 30 : i32
      %322 = tpu.dynamic_rotate %281 by %c30_i32 dim 0 : vector<32x128xf32>, i32 -> vector<32x128xf32>
      %c2_i32_60 = arith.constant 2 : i32
      %323 = vector.broadcast %c2_i32_60 : i32 to vector<32x128xi32>
      %324 = arith.addi %282, %323 : vector<32x128xi32>
      %c0_i32_61 = arith.constant 0 : i32
      %325 = vector.broadcast %c0_i32_61 : i32 to vector<32x128xi32>
      %326 = arith.cmpi sge, %324, %325 : vector<32x128xi32>
      %c2_i32_62 = arith.constant 2 : i32
      %327 = vector.broadcast %c2_i32_62 : i32 to vector<32x128xi32>
      %328 = arith.addi %282, %327 : vector<32x128xi32>
      %c32_i32_63 = arith.constant 32 : i32
      %329 = vector.broadcast %c32_i32_63 : i32 to vector<32x128xi32>
      %330 = arith.cmpi slt, %328, %329 : vector<32x128xi32>
      %331 = arith.andi %326, %330 : vector<32x128xi1>
      %cst_64 = arith.constant 0.000000e+00 : f32
      %332 = vector.broadcast %cst_64 : f32 to vector<32x128xf32>
      %333 = arith.select %331, %322, %332 : vector<32x128xi1>, vector<32x128xf32>
      %334 = arith.addf %321, %333 : vector<32x128xf32>
      %cst_65 = arith.constant 0.000000e+00 : f32
      %335 = vector.broadcast %cst_65 : f32 to vector<32x128xf32>
      %336 = arith.subf %335, %334 : vector<32x128xf32>
      %337 = math.exp %336 : vector<32x128xf32>
      %cst_66 = arith.constant 1.000000e+00 : f32
      %338 = vector.broadcast %cst_66 : f32 to vector<32x128xf32>
      %339 = arith.addf %338, %337 : vector<32x128xf32>
      %cst_67 = arith.constant 1.000000e+00 : f32
      %340 = vector.broadcast %cst_67 : f32 to vector<32x128xf32>
      %341 = arith.divf %340, %339 : vector<32x128xf32>
      %c0_68 = arith.constant 0 : index
      %c0_69 = arith.constant 0 : index
      %342 = vector.load %arg5[%c0_68, %c0_69] : memref<32x128xf32, #tpu.memory_space<vmem>>, vector<32x128xf32>
      tpu.vector_store %arg5[%c0_68, %c0_69], %341 {strides = array<i32>} : memref<32x128xf32, #tpu.memory_space<vmem>>, vector<32x128xf32>,
    } else {
    }
    %c8_i32 = arith.constant 8 : i32
    %3 = arith.muli %arg1, %c8_i32 : i32
    %4 = tpu.assume_multiple %3, 8 : i32
    %5 = arith.index_cast %4 : i32 to index
    %c0 = arith.constant 0 : index
    %6 = vector.load %arg5[%5, %c0] : memref<32x128xf32, #tpu.memory_space<vmem>>, vector<8x128xf32>
    %c0_i32_1 = arith.constant 0 : i32
    %c4_i32 = arith.constant 4 : i32
    %7 = arith.addi %c0_i32_1, %c4_i32 : i32
    %c1_i32 = arith.constant 1 : i32
    scf.for %arg6 = %c0_i32_1 to %7 step %c1_i32  : i32 {
      %c16_i32 = arith.constant 16 : i32
      %8 = arith.muli %arg6, %c16_i32 : i32
      %9 = tpu.assume_multiple %8, 16 : i32
      %c0_3 = arith.constant 0 : index
      %10 = arith.index_cast %9 : i32 to index
      %11 = arith.index_cast %4 : i32 to index
      %c0_4 = arith.constant 0 : index
      %12 = vector.load %arg3[%c0_3, %10, %11, %c0_4] : memref<1x64x32x128xf32, #tpu.memory_space<vmem>>, vector<1x16x8x128xf32>
      %13 = vector.shape_cast %12 : vector<1x16x8x128xf32> to vector<16x8x128xf32>
      %14 = vector.shape_cast %6 : vector<8x128xf32> to vector<1x8x128xf32>
      %15 = vector.broadcast %14 : vector<1x8x128xf32> to vector<16x8x128xf32>
      %16 = arith.mulf %13, %15 : vector<16x8x128xf32>
      %c0_5 = arith.constant 0 : index
      %17 = arith.index_cast %9 : i32 to index
      %c0_6 = arith.constant 0 : index
      %c0_7 = arith.constant 0 : index
      %18 = vector.load %arg4[%c0_5, %17, %c0_6, %c0_7] : memref<1x64x8x128xf32, #tpu.memory_space<vmem>>, vector<1x16x8x128xf32>
      %19 = vector.shape_cast %18 : vector<1x16x8x128xf32> to vector<16x8x128xf32>
      %20 = vector.shape_cast %16 : vector<16x8x128xf32> to vector<1x16x8x128xf32>
      tpu.vector_store %arg4[%c0_5, %17, %c0_6, %c0_7], %20 {strides = array<i32>} : memref<1x64x8x128xf32, #tpu.memory_space<vmem>>, vector<1x16x8x128xf32>,
    }
    %c4_i32_2 = arith.constant 4 : i32
    return
  }
  func.func @transform_0(%arg0: i32, %arg1: i32) -> i32 {
    %c0_i32 = arith.constant 0 : i32
    %c0_i32_0 = arith.constant 0 : i32
    return %c0_i32 : i32
  }
  func.func @transform_1(%arg0: i32, %arg1: i32) -> (i32, i32, i32, i32) {
    %c0_i32 = arith.constant 0 : i32
    %c0_i32_0 = arith.constant 0 : i32
    %c0_i32_1 = arith.constant 0 : i32
    %c0_i32_2 = arith.constant 0 : i32
    return %arg0, %c0_i32, %c0_i32_0, %c0_i32_1 : i32, i32, i32, i32
  }
  func.func @transform_2(%arg0: i32, %arg1: i32) -> (i32, i32, i32, i32) {
    %c0_i32 = arith.constant 0 : i32
    %c0_i32_0 = arith.constant 0 : i32
    %c0_i32_1 = arith.constant 0 : i32
    return %arg0, %c0_i32, %arg1, %c0_i32_0 : i32, i32, i32, i32
  }
}

</mosaic_0001>

<bundles_post_ra>
// kernel: sa_layer.1
= control target key start
LH: loop header
LB: loop body
LE: loop exit
PB: predicated region body
PF: predicated region fallthrough
CT: control target
= control target key end

     0   :  { %s3199_s0 = inlined_call_operand.vmem [shape: f32[50], index: 0, kind: input, shape index: {}]   ;;  %s3200_s1 = inlined_call_operand.hbm [shape: f32[2,64,32,128], index: 1, kind: input, shape index: {}]   ;;  %s3201_s2 = inlined_call_operand.hbm [shape: f32[2,64,32,128], index: 2, kind: output, shape index: {}]  }
   0x1   :  { %3251 = sst [smem:[#allocation94_spill]] %s3199_s0 }
   0x2   :  { %3252 = sst [smem:[#allocation95_spill]] %s3200_s1 }
   0x3   :  { %3253 = sst [smem:[#allocation96_spill]] %s3201_s2 }
   0x4   :  { %7 = vsyncpa [#allocation6], 0 }
   0x5   :  { %8 = vsyncpa [#allocation4], 0 }
   0x6   :  { %10 = vsyncpa [#allocation4 + $0x1], 0 }
   0x7   :  { %11 = vsyncpa [#allocation5], 0 }
   0x8   :  { %13 = vsyncpa [#allocation5 + $0x1], 0  ;;  %s1969_s9 = smov 0   ;;  %s1971_s10 = smov 0  }
   0x9   :  { %s1973_s11 = smov 0   ;;  %s1975_s12 = smov 0  }
   0xa   :  { %s1977_s13 = smov 0   ;;  %s1979_s14 = smov 0  }
   0xb   :  { %s1981_s15 = smov 0   ;;  %s1983_s16 = smov 0  }
   0xc   :  { %s1985_s17 = smov 0   ;;  %s1987_s18 = smov 0  }
   0xd   :  { %s1989_s19 = smov 0  }
   0xe LB: > { %3254 = sst [smem:[#allocation12_spill]] %s1860_s9  ;;  %s1398_s20 = sadd.s32 4294967295, %s1900_s19   ;;  %s1900_s19 = sphi %s1989_s19, %s19_s19   ;;  %s1896_s18 = sphi %s1987_s18, %s3451_s18   ;;  %s1892_s17 = sphi %s1985_s17, %s3450_s17   ;;  %s1888_s16 = sphi %s1983_s16, %s3449_s16   ;;  %s1884_s15 = sphi %s1981_s15, %s3448_s15   ;;  %s1880_s14 = sphi %s1979_s14, %s3447_s14   ;;  %s1876_s13 = sphi %s1977_s13, %s3446_s13   ;;  %s1872_s12 = sphi %s1975_s12, %s3445_s12   ;;  %s1868_s11 = sphi %s1973_s11, %s3444_s11   ;;  %s1864_s10 = sphi %s1971_s10, %s3443_s10   ;;  %s1860_s9 = sphi %s1969_s9, %s3442_s9  }
   0xf   : > { %3255 = sst [smem:[#allocation13_spill]] %s1864_s10  ;;  %s1399_s21 = sadd.s32 4294967294, %s1900_s19  }
  0x10   : > { %3256 = sst [smem:[#allocation14_spill]] %s1868_s11  ;;  %p66_p0 = scmp.ne.s32.totalorder %s1880_s14, %s1876_s13 }
  0x11   : > { %3257 = sst [smem:[#allocation15_spill]] %s1876_s13  ;;  %p67_p1 = scmp.eq.s32.totalorder %s1900_s19, 0 }
  0x12   : > { %3258 = sst [smem:[#allocation16_spill]] %s1880_s14  ;;  %p72_p2 = scmp.ne.s32.totalorder %s1876_s13, %s1872_s12 }
  0x13   : > { %3259 = sst [smem:[#allocation17_spill]] %s1884_s15  ;;  %p2029_p3 = scmp.eq.s32.totalorder %s1398_s20, 0 }
  0x14   : > { %3260 = sst [smem:[#allocation18_spill]] %s1888_s16  ;;  %p2033_p4 = por %p67_p1, %p66_p0 }
  0x15   : > { %3261 = sst [smem:[#allocation19_spill]] %s1892_s17  ;;  %p97_p5 = scmp.ne.s32.totalorder %s1868_s11, %s1864_s10 }
  0x16   : > { %3262 = sst [smem:[#allocation20_spill]] %s1896_s18  ;;  %p2041_p6 = por %p2029_p3, %p72_p2 }
  0x17   : > { %3263 = sst [smem:[#allocation21_spill]] %s1900_s19  ;;  %p98_p7 = scmp.eq.s32.totalorder %s1398_s20, 7 }
  0x18   : > { %s3266_s25 = scalar_select %p2041_p6, 1, 0 }
  0x19   : > { %p103_p8 = scmp.ne.s32.totalorder %s1864_s10, %s1860_s9  ;;  %p104_p9 = scmp.eq.s32.totalorder %s1399_s21, 7 }
  0x1a   : > { %p2047_p10 = por %p98_p7, %p97_p5  ;;  %p1400_p11 = scmp.ge.s32.totalorder %s1900_s19, 1 }
  0x1b   : > { %p2052_p12 = por %p104_p9, %p103_p8  ;;  %p111_p13 = scmp.lt.s32.totalorder %s1900_s19, 9 }
  0x1c   : > { %s3267_s26 = scalar_select %p2047_p10, 1, 0 }
  0x1d   : > { %s3269_s27 = scalar_select %p2052_p12, 1, 0 }
  0x1e   : > { %3268 = sst [smem:[#allocation22_spill]] %s3267_s26  ;;  %p2060_p0 = pnand %p1400_p11, %p111_p13 }
  0x1f   : > { %3270 = sst [smem:[#allocation23_spill]] %s3269_s27  ;;  %p1496_p2 = scmp.lt.s32.totalorder %s1900_s19, 8 }
  0x20   : > { %s3271_s0 = sld [smem:[#allocation94_spill]]  ;;  %p1483_p1 = pneg %p2060_p0 }
  0x21   : > { %s3272_s3 = scalar_select %p2060_p0, 1, 0 }
  0x22   : > { %p1484_p5 = pnand %p1483_p1, %p2029_p3  ;;  %p2071_p7 = pnand %p1496_p2, %p2033_p4 }
  0x24   : > { %p1695_p9 = pneg %p1484_p5 }
  0x26   : > { %s124_s30 = sshll.u32 %s3271_s0, 4  ;;  %s125_s30 = int_to_ptr.vmem [resolvable:$true] %s124_s30 }
  0x27   : > { %s1693_s5 = scalar_lea.vmem %s125_s30, 16  ;;  %p1701_p13 = scmp.lt.s32.totalorder %s125_s30, %s125_s30 }
  0x28   : > { %p1694_p8 = scmp.ne.s32.totalorder %s125_s30, %s1693_s5  ;;  %p1702_p10 = scmp.lt.s32.totalorder %s1693_s5, %s1693_s5 }
  0x2a   : > { %p1696_p12 = pnand %p1695_p9, %p1694_p8  ;;  %p1703_p6 = por %p1702_p10, %p1701_p13 }
  0x2c   : > { %p1697_p11 = pneg %p1696_p12 }
  0x2e   : > { %p1704_p0 = pnand %p1703_p6, %p1697_p11 }
  0x30   : > { %1707 = shalt.err (!%p1704_p0)
}
  0x31   : > { %s1942_s6 = smov [#allocation3]   ;;  %s28_s7 = sadd.s32 1, %s1892_s17 }
  0x32   : > { %1486 = dma.vmem_to_smem (!%p1484_p5), %s125_s30, 16, %s1942_s6, [#allocation6]  }
  0x33   : > { %s31_s8 = sadd.s32 1, %s1896_s18  ;;  %p29_p4 = scmp.ge.s32.totalorder %s28_s7, 4 }
  0x34   : > { %s135_s12 = sand.u32 1, %s1880_s14   ;;  %s87_s20 = sadd.s32 1, %s1868_s11 }
  0x35   : > { %s1403_s21 = sshll.u32 %s135_s12, 11  ;;  %s3453_s7 = smov (%p29_p4, %s28_s7), 0 }
  0x36   : > { %3274 = sst [smem:[#allocation24_spill]] %s3453_s7  ;;  %s3455_s8 = smov (!%p29_p4, %s31_s8), %s1896_s18 }
  0x37   : > { %p33_p6 = scmp.ge.s32.totalorder %s3455_s8, 2  ;;  %s1471_s24 = sshll.u32 %s1896_s18, 15 }
  0x38   : > { %s83_s28 = ssub.s32 %s1892_s17, %s3453_s7  ;;  %s139_s29 = scalar_lea.vmem [#allocation7], %s1403_s21 }
  0x39   : > { %s146_s30 = sshll.u32 %s139_s29, 4  ;;  %s3457_s8 = smov (%p33_p6, %s3455_s8), 0  ;;  %s147_s30 = int_to_ptr.vmem [resolvable:$true] %s146_s30 }
  0x3a   : > { %3275 = sst [smem:[#allocation25_spill]] %s3457_s8  ;;  %s56_s0 = ssub.s32 %s1896_s18, %s3457_s8 }
  0x3b   : > { %s3276_s1 = sld [smem:[#allocation95_spill]]  ;;  %p57_p10 = scmp.eq.s32.totalorder %s56_s0, 0 }
  0x3c   : > { %s84_s27 = sor.u32 %s83_s28, %s56_s0  ;;  %s3277_s9 = sadd.s32 1, %s1880_s14 }
  0x3d   : > { %p85_p12 = scmp.eq.s32.totalorder %s84_s27, 0  ;;  %s136_s21 = scalar_lea.sflag [#allocation4], %s135_s12 }
  0x3e   : > { %s2097_s19 = scalar_select %p57_p10, %s1880_s14, %s3277_s9  }
  0x3f   : > { %s2100_s2 = scalar_select %p85_p12, %s1868_s11, %s87_s20  }
  0x40   : > { %3278 = sst [smem:[#allocation26_spill]] %s2097_s19  ;;  %p1710_p0 = pneg %p2071_p7 }
  0x41   : > { %s2090_s22 = scalar_lea.hbm %s3276_s1, %s1471_s24  ;;  %3279 = sst [smem:[#allocation27_spill]] %s2100_s2 }
  0x42   : > { %s1721_s29 = scalar_lea.vmem %s147_s30, 32768  ;;  %s1943_s5 = smov [#allocation7]  }
  0x43   : > { %p1722_p1 = scmp.ne.s32.totalorder %s147_s30, %s1721_s29  ;;  %s1726_s24 = sshll.u32 %s1943_s5, 4  ;;  %s1727_s24 = int_to_ptr.vmem [resolvable:$false] %s1726_s24 }
  0x44   : > { %s1728_s6 = scalar_lea.vmem %s1727_s24, 65536  ;;  %p1729_p8 = scmp.lt.s32.totalorder %s147_s30, %s1727_s24 }
  0x45   : > { %p1724_p2 = pnand %p1722_p1, %p1710_p0  ;;  %p1730_p9 = scmp.lt.s32.totalorder %s1728_s6, %s1721_s29 }
  0x47   : > { %p1725_p5 = pneg %p1724_p2  ;;  %p1731_p11 = por %p1730_p9, %p1729_p8 }
  0x49   : > { %p1732_p13 = pnand %p1731_p11, %p1725_p5 }
  0x4b   : > { %1735 = shalt.err (!%p1732_p13)
}
  0x4c   : > { %s1944_s0 = smov 128   ;;  %s1945_s9 = smov 8  }
  0x4d   : > { %1490 = dma.hbm_to_vmem [thread:$0]  (!%p2071_p7), %s2090_s22, 32768, %s147_s30, %s136_s21, %s1944_s0, %s1944_s0, %s1945_s9  }
  0x4e   : > { %p3280_p4 = scmp.ne.s32.totalorder %s3272_s3, 0 }
  0x50   : > { %158 = sbr.rel (%p3280_p4) target bundleno = 452 (0x1c4), region = 28 }
  0x55   : > { %1847 = dma.done.wait (%p2029_p3), [#allocation6], 16  }
  0x56   : > { %1849 = vsyncadd (%p2029_p3), [#allocation6], 4294967280  ;;  %s164_s27 = sand.u32 1, %s1876_s13   ;;  %p3282_p6 = scmp.ne.s32.totalorder %s3266_s25, 0 }
  0x57   : > { %s1408_s12 = sshll.u32 %s164_s27, 11  ;;  %s165_s20 = scalar_lea.sflag [#allocation4], %s164_s27 }
  0x58   : > { %s2114_s28 = scalar_lea.vmem [#allocation7], %s1408_s12 }
  0x59   : > { %3281 = sst [smem:[#allocation28_spill]] %s2114_s28 }
  0x5a   : > { %1851 = dma.done.wait (%p3282_p6), %s165_s20, 32768  }
  0x5b   : > { %1853 = vsyncadd (%p3282_p6), %s165_s20, 4294934528 }
  0x5c   : > { %173 = sfence }
  0x5d   : > { %s3210_s22 = sand.u32 1, %s1864_s10   ;;  %p1410_p3 = scmp.ne.s32.totalorder %s1884_s15, 0 }
  0x5e   : > { %s2123_s3 = sshll.u32 %s3210_s22, 9 }
  0x5f   : > { %3283 = sst [smem:[#allocation29_spill]] %s2123_s3  ;;  %193 = sbr.rel (%p1410_p3) target bundleno = 403 (0x193), region = 40 }
  0x64   : > { %v194_v0 = vld [vmem:[%s2114_s28] sm:$0xff]  ;;  %v195_v1 = vld [vmem:[%s2114_s28 + $0x8] sm:$0xff]  ;;  %v196_v2 = vld [vmem:[%s2114_s28 + $0x10] sm:$0xff]  ;;  %s2175_s25 = smov 1  }
  0x65   : > { %v197_v3 = vld [vmem:[%s2114_s28 + $0x18] sm:$0xff]  ;;  %v198_v4 = vld [vmem:[%s2114_s28 + $0x20] sm:$0xff]  ;;  %v199_v5 = vld [vmem:[%s2114_s28 + $0x28] sm:$0xff] }
  0x66   : > { %v200_v6 = vld [vmem:[%s2114_s28 + $0x30] sm:$0xff]  ;;  %v201_v7 = vld [vmem:[%s2114_s28 + $0x38] sm:$0xff]  ;;  %v202_v8 = vld [vmem:[%s2114_s28 + $0x40] sm:$0xff]  ;;  %v226_v9 = vmax.f32 %v194_v0, %v198_v4  ;;  %v233_v10 = vmax.f32 %v195_v1, %v199_v5  ;;  %v254_v11 = vadd.f32 %v198_v4, %v194_v0  ;;  %v261_v12 = vadd.f32 %v199_v5, %v195_v1 }
  0x67   : > { %v203_v13 = vld [vmem:[%s2114_s28 + $0x48] sm:$0xff]  ;;  %v204_v14 = vld [vmem:[%s2114_s28 + $0x50] sm:$0xff]  ;;  %v205_v15 = vld [vmem:[%s2114_s28 + $0x58] sm:$0xff]  ;;  %v240_v16 = vmax.f32 %v196_v2, %v200_v6  ;;  %v247_v17 = vmax.f32 %v197_v3, %v201_v7  ;;  %v268_v18 = vadd.f32 %v200_v6, %v196_v2  ;;  %v275_v19 = vadd.f32 %v201_v7, %v197_v3 }
  0x68   : > { %v206_v20 = vld [vmem:[%s2114_s28 + $0x60] sm:$0xff]  ;;  %v207_v21 = vld [vmem:[%s2114_s28 + $0x68] sm:$0xff]  ;;  %v208_v22 = vld [vmem:[%s2114_s28 + $0x70] sm:$0xff]  ;;  %v227_v23 = vmax.f32 %v226_v9, %v202_v8  ;;  %v234_v24 = vmax.f32 %v233_v10, %v203_v13  ;;  %v255_v25 = vadd.f32 %v254_v11, %v202_v8  ;;  %v262_v26 = vadd.f32 %v261_v12, %v203_v13 }
  0x69   : > { %v209_v27 = vld [vmem:[%s2114_s28 + $0x78] sm:$0xff]  ;;  %v210_v28 = vld [vmem:[%s2114_s28 + $0x80] sm:$0xff]  ;;  %v211_v29 = vld [vmem:[%s2114_s28 + $0x88] sm:$0xff]  ;;  %v241_v30 = vmax.f32 %v240_v16, %v204_v14  ;;  %v248_v31 = vmax.f32 %v247_v17, %v205_v15  ;;  %v269_v32 = vadd.f32 %v268_v18, %v204_v14  ;;  %v276_v33 = vadd.f32 %v275_v19, %v205_v15 }
  0x6a   : > { %v212_v34 = vld [vmem:[%s2114_s28 + $0x90] sm:$0xff]  ;;  %v213_v35 = vld [vmem:[%s2114_s28 + $0x98] sm:$0xff]  ;;  %v228_v36 = vmax.f32 %v227_v23, %v206_v20  ;;  %v235_v37 = vmax.f32 %v234_v24, %v207_v21  ;;  %v256_v38 = vadd.f32 %v255_v25, %v206_v20  ;;  %v263_v39 = vadd.f32 %v262_v26, %v207_v21  ;;  %v214_v40 = vld [vmem:[%s2114_s28 + $0xa0] sm:$0xff] }
  0x6b   : > { %v215_v41 = vld [vmem:[%s2114_s28 + $0xa8] sm:$0xff]  ;;  %v242_v42 = vmax.f32 %v241_v30, %v208_v22  ;;  %v249_v43 = vmax.f32 %v248_v31, %v209_v27  ;;  %v270_v44 = vadd.f32 %v269_v32, %v208_v22  ;;  %v277_v45 = vadd.f32 %v276_v33, %v209_v27  ;;  %v216_v46 = vld [vmem:[%s2114_s28 + $0xb0] sm:$0xff]  ;;  %v217_v47 = vld [vmem:[%s2114_s28 + $0xb8] sm:$0xff] }
  0x6c   : > { %v229_v48 = vmax.f32 %v228_v36, %v210_v28  ;;  %v236_v49 = vmax.f32 %v235_v37, %v211_v29  ;;  %v257_v50 = vadd.f32 %v256_v38, %v210_v28  ;;  %v264_v51 = vadd.f32 %v263_v39, %v211_v29  ;;  %v218_v52 = vld [vmem:[%s2114_s28 + $0xc0] sm:$0xff]  ;;  %v219_v53 = vld [vmem:[%s2114_s28 + $0xc8] sm:$0xff]  ;;  %v220_v58 = vld [vmem:[%s2114_s28 + $0xd0] sm:$0xff] }
  0x6d   : > { %v243_v54 = vmax.f32 %v242_v42, %v212_v34  ;;  %v250_v55 = vmax.f32 %v249_v43, %v213_v35  ;;  %v271_v56 = vadd.f32 %v270_v44, %v212_v34  ;;  %v278_v57 = vadd.f32 %v277_v45, %v213_v35  ;;  %v221_v59 = vld [vmem:[%s2114_s28 + $0xd8] sm:$0xff]  ;;  %v222_v0 = vld [vmem:[%s2114_s28 + $0xe0] sm:$0xff]  ;;  %v223_v1 = vld [vmem:[%s2114_s28 + $0xe8] sm:$0xff] }
  0x6e   : > { %v230_v60 = vmax.f32 %v229_v48, %v214_v40  ;;  %v237_v61 = vmax.f32 %v236_v49, %v215_v41  ;;  %v258_v62 = vadd.f32 %v257_v50, %v214_v40  ;;  %v265_v63 = vadd.f32 %v264_v51, %v215_v41  ;;  %v224_v6 = vld [vmem:[%s2114_s28 + $0xf0] sm:$0xff]  ;;  %v225_v7 = vld [vmem:[%s2114_s28 + $0xf8] sm:$0xff] }
  0x6f   : > { %v244_v2 = vmax.f32 %v243_v54, %v216_v46  ;;  %v251_v3 = vmax.f32 %v250_v55, %v217_v47  ;;  %v272_v4 = vadd.f32 %v271_v56, %v216_v46  ;;  %v279_v5 = vadd.f32 %v278_v57, %v217_v47 }
  0x70   : > { %v231_v8 = vmax.f32 %v230_v60, %v218_v52  ;;  %v238_v9 = vmax.f32 %v237_v61, %v219_v53  ;;  %v259_v10 = vadd.f32 %v258_v62, %v218_v52  ;;  %v266_v11 = vadd.f32 %v265_v63, %v219_v53 }
  0x71   : > { %v245_v12 = vmax.f32 %v244_v2, %v220_v58  ;;  %v252_v13 = vmax.f32 %v251_v3, %v221_v59  ;;  %v273_v14 = vadd.f32 %v272_v4, %v220_v58  ;;  %v280_v15 = vadd.f32 %v279_v5, %v221_v59 }
  0x72   : > { %v232_v16 = vmax.f32 %v231_v8, %v222_v0   ;;  %v239_v17 = vmax.f32 %v238_v9, %v223_v1   ;;  %v260_v18 = vadd.f32 %v259_v10, %v222_v0   ;;  %v267_v19 = vadd.f32 %v266_v11, %v223_v1  }
  0x73   : > { %v246_v20 = vmax.f32 %v245_v12, %v224_v6   ;;  %v253_v21 = vmax.f32 %v252_v13, %v225_v7   ;;  %v274_v22 = vadd.f32 %v273_v14, %v224_v6   ;;  %v281_v23 = vadd.f32 %v280_v15, %v225_v7  }
  0x74 LB: >> { %s1472_s4 = sshll.u32 %s1936_s25, 8  ;;  %s287_s25 = sadd.s32 1, %s1936_s25   ;;  %s1936_s25 = sphi %s2175_s25, %s287_s25   ;;  %v1932_v16 = vphi %v232_v16, %v3295_v16   ;;  %v1928_v17 = vphi %v239_v17, %v3294_v17   ;;  %v1924_v20 = vphi %v246_v20, %v3293_v20   ;;  %v1920_v21 = vphi %v253_v21, %v3292_v21   ;;  %v1916_v18 = vphi %v260_v18, %v3291_v18   ;;  %v1912_v19 = vphi %v267_v19, %v3290_v19   ;;  %v1908_v22 = vphi %v274_v22, %v3289_v22   ;;  %v1904_v23 = vphi %v281_v23, %v3288_v23  }
  0x75   : >> { %s2206_s30 = scalar_lea.vmem %s2114_s28, %s1472_s4 [#allocation7]  ;;  %p284_p7 = scmp.ge.s32.totalorder %s287_s25, 8  }
  0x76   : >> { %v299_v24 = vld [vmem:[%s2206_s30] sm:$0xff]  ;;  %v300_v25 = vld [vmem:[%s2206_s30 + $0x8] sm:$0xff]  ;;  %v301_v26 = vld [vmem:[%s2206_s30 + $0x10] sm:$0xff]  ;;  %s1946_s21 = smov (%p284_p7), 2   ;;  %s1947_s29 = smov (%p284_p7), 1  }
  0x77   : >> { %v302_v27 = vld [vmem:[%s2206_s30 + $0x18] sm:$0xff]  ;;  %v303_v28 = vld [vmem:[%s2206_s30 + $0x20] sm:$0xff]  ;;  %v304_v29 = vld [vmem:[%s2206_s30 + $0x28] sm:$0xff]  ;;  %s1948_s5 = smov (%p284_p7), 127   ;;  %s1949_s24 = smov (%p284_p7), 126  }
  0x78   : >> { %v305_v30 = vld [vmem:[%s2206_s30 + $0x30] sm:$0xff]  ;;  %v306_v31 = vld [vmem:[%s2206_s30 + $0x38] sm:$0xff]  ;;  %v307_v32 = vld [vmem:[%s2206_s30 + $0x40] sm:$0xff]  ;;  %v331_v33 = vmax.f32 %v299_v24, %v303_v28  ;;  %v338_v34 = vmax.f32 %v300_v25, %v304_v29  ;;  %v363_v35 = vadd.f32 %v303_v28, %v299_v24  ;;  %v370_v36 = vadd.f32 %v304_v29, %v300_v25  ;;  %s2318_s6 = sld [smem:[#allocation3]] (%p284_p7) }
  0x79   : >> { %v308_v37 = vld [vmem:[%s2206_s30 + $0x48] sm:$0xff]  ;;  %v309_v38 = vld [vmem:[%s2206_s30 + $0x50] sm:$0xff]  ;;  %v310_v39 = vld [vmem:[%s2206_s30 + $0x58] sm:$0xff]  ;;  %v345_v40 = vmax.f32 %v301_v26, %v305_v30  ;;  %v352_v41 = vmax.f32 %v302_v27, %v306_v31  ;;  %v377_v42 = vadd.f32 %v305_v30, %v301_v26  ;;  %v384_v43 = vadd.f32 %v306_v31, %v302_v27  ;;  %s2321_s0 = sld [smem:[#allocation3 + $0x5]] (%p284_p7) }
  0x7a   : >> { %v311_v44 = vld [vmem:[%s2206_s30 + $0x60] sm:$0xff]  ;;  %v312_v45 = vld [vmem:[%s2206_s30 + $0x68] sm:$0xff]  ;;  %v313_v46 = vld [vmem:[%s2206_s30 + $0x70] sm:$0xff]  ;;  %v332_v47 = vmax.f32 %v331_v33, %v307_v32  ;;  %v339_v48 = vmax.f32 %v338_v34, %v308_v37  ;;  %v364_v49 = vadd.f32 %v363_v35, %v307_v32  ;;  %v371_v50 = vadd.f32 %v370_v36, %v308_v37  ;;  %s2323_s9 = sld [smem:[#allocation3 + $0xa]] (%p284_p7) }
  0x7b   : >> { %v314_v51 = vld [vmem:[%s2206_s30 + $0x78] sm:$0xff]  ;;  %v315_v52 = vld [vmem:[%s2206_s30 + $0x80] sm:$0xff]  ;;  %v316_v53 = vld [vmem:[%s2206_s30 + $0x88] sm:$0xff]  ;;  %v346_v54 = vmax.f32 %v345_v40, %v309_v38  ;;  %v353_v55 = vmax.f32 %v352_v41, %v310_v39  ;;  %v378_v56 = vadd.f32 %v377_v42, %v309_v38  ;;  %v385_v57 = vadd.f32 %v384_v43, %v310_v39  ;;  %s2325_s27 = sld [smem:[#allocation3 + $0xf]] (%p284_p7) }
  0x7c   : >> { %v317_v58 = vld [vmem:[%s2206_s30 + $0x90] sm:$0xff]  ;;  %v318_v59 = vld [vmem:[%s2206_s30 + $0x98] sm:$0xff]  ;;  %v333_v60 = vmax.f32 %v332_v47, %v311_v44  ;;  %v340_v61 = vmax.f32 %v339_v48, %v312_v45  ;;  %v365_v62 = vadd.f32 %v364_v49, %v311_v44  ;;  %v372_v63 = vadd.f32 %v371_v50, %v312_v45  ;;  %v319_v0 = vld [vmem:[%s2206_s30 + $0xa0] sm:$0xff]  ;;  %s2327_s12 = sld [smem:[#allocation3 + $0x14]] (%p284_p7) }
  0x7d   : >> { %v320_v1 = vld [vmem:[%s2206_s30 + $0xa8] sm:$0xff]  ;;  %v347_v2 = vmax.f32 %v346_v54, %v313_v46  ;;  %v354_v3 = vmax.f32 %v353_v55, %v314_v51  ;;  %v379_v4 = vadd.f32 %v378_v56, %v313_v46  ;;  %v386_v5 = vadd.f32 %v385_v57, %v314_v51  ;;  %v321_v6 = vld [vmem:[%s2206_s30 + $0xb0] sm:$0xff]  ;;  %v322_v7 = vld [vmem:[%s2206_s30 + $0xb8] sm:$0xff]  ;;  %s2329_s20 = sld [smem:[#allocation3 + $0x19]] (%p284_p7) }
  0x7e   : >> { %v334_v8 = vmax.f32 %v333_v60, %v315_v52  ;;  %v341_v9 = vmax.f32 %v340_v61, %v316_v53  ;;  %v366_v10 = vadd.f32 %v365_v62, %v315_v52  ;;  %v373_v11 = vadd.f32 %v372_v63, %v316_v53  ;;  %v323_v12 = vld [vmem:[%s2206_s30 + $0xc0] sm:$0xff]  ;;  %v324_v13 = vld [vmem:[%s2206_s30 + $0xc8] sm:$0xff]  ;;  %v325_v26 = vld [vmem:[%s2206_s30 + $0xd0] sm:$0xff]  ;;  %s2331_s25 = sld [smem:[#allocation3 + $0x1e]] (%p284_p7) }
  0x7f   : >> { %v348_v14 = vmax.f32 %v347_v2, %v317_v58  ;;  %v355_v15 = vmax.f32 %v354_v3, %v318_v59  ;;  %v380_v24 = vadd.f32 %v379_v4, %v317_v58  ;;  %v387_v25 = vadd.f32 %v386_v5, %v318_v59  ;;  %v326_v27 = vld [vmem:[%s2206_s30 + $0xd8] sm:$0xff]  ;;  %v327_v32 = vld [vmem:[%s2206_s30 + $0xe0] sm:$0xff]  ;;  %v328_v33 = vld [vmem:[%s2206_s30 + $0xe8] sm:$0xff]  ;;  %s2333_s4 = sld [smem:[#allocation3 + $0x23]] (%p284_p7) }
  0x80   : >> { %v335_v28 = vmax.f32 %v334_v8, %v319_v0  ;;  %v342_v29 = vmax.f32 %v341_v9, %v320_v1  ;;  %v367_v30 = vadd.f32 %v366_v10, %v319_v0  ;;  %v374_v31 = vadd.f32 %v373_v11, %v320_v1  ;;  %v329_v38 = vld [vmem:[%s2206_s30 + $0xf0] sm:$0xff]  ;;  %v330_v39 = vld [vmem:[%s2206_s30 + $0xf8] sm:$0xff]  ;;  %s2335_s30 = sld [smem:[#allocation3 + $0x28]] (%p284_p7) }
  0x81   : >> { %v349_v34 = vmax.f32 %v348_v14, %v321_v6  ;;  %v356_v35 = vmax.f32 %v355_v15, %v322_v7  ;;  %v381_v36 = vadd.f32 %v380_v24, %v321_v6  ;;  %v388_v37 = vadd.f32 %v387_v25, %v322_v7  ;;  %s2345_s22 = sld [smem:[#allocation3 + $0x10]] (%p284_p7) }
  0x82   : >> { %v336_v40 = vmax.f32 %v335_v28, %v323_v12  ;;  %v343_v41 = vmax.f32 %v342_v29, %v324_v13  ;;  %v368_v42 = vadd.f32 %v367_v30, %v323_v12  ;;  %v375_v43 = vadd.f32 %v374_v31, %v324_v13  ;;  %s2347_s23 = sld [smem:[#allocation3 + $0x15]] (%p284_p7) }
  0x83   : >> { %v350_v44 = vmax.f32 %v349_v34, %v325_v26  ;;  %v357_v45 = vmax.f32 %v356_v35, %v326_v27  ;;  %v382_v46 = vadd.f32 %v381_v36, %v325_v26  ;;  %v389_v47 = vadd.f32 %v388_v37, %v326_v27  ;;  %s2349_s1 = sld [smem:[#allocation3 + $0x1a]] (%p284_p7) }
  0x84   : >> { %v337_v48 = vmax.f32 %v336_v40, %v327_v32  ;;  %v344_v49 = vmax.f32 %v343_v41, %v328_v33  ;;  %v369_v50 = vadd.f32 %v368_v42, %v327_v32  ;;  %v376_v51 = vadd.f32 %v375_v43, %v328_v33  ;;  %s2351_s8 = sld [smem:[#allocation3 + $0x1f]] (%p284_p7) }
  0x85   : >> { %v351_v52 = vmax.f32 %v350_v44, %v329_v38  ;;  %v358_v53 = vmax.f32 %v357_v45, %v330_v39  ;;  %v383_v54 = vadd.f32 %v382_v46, %v329_v38  ;;  %v390_v55 = vadd.f32 %v389_v47, %v330_v39  ;;  %s2353_s7 = sld [smem:[#allocation3 + $0x24]] (%p284_p7) }
  0x86   : >> { %v2241_v16 = vmax.f32 %v1932_v16, %v337_v48   ;;  %v2244_v17 = vmax.f32 %v1928_v17, %v344_v49   ;;  %v391_v58 = vadd.f32 %v1916_v18, %v369_v50   ;;  %v392_v59 = vadd.f32 %v1912_v19, %v376_v51   ;;  %286 = sbr.rel (!%p284_p7) target bundleno = 116 (0x74), region = 100  ;;  %s2355_s18 = sld [smem:[#allocation3 + $0x29]] (%p284_p7) }
  0x87   : >> { %v2249_v20 = vmax.f32 %v1924_v20, %v351_v52   ;;  %v2252_v21 = vmax.f32 %v1920_v21, %v358_v53   ;;  %v393_v62 = vadd.f32 %v1908_v22, %v383_v54   ;;  %v394_v63 = vadd.f32 %v1904_v23, %v390_v55   ;;  %s2357_s17 = sld [smem:[#allocation3 + $0x2e]] (%p284_p7) }
  0x88   : >> { %v3284_v56 = vmov %v2241_v16  ;;  %v3285_v57 = vmov %v2244_v17  ;;  %v3290_v19 = vmov %v392_v59  ;;  %v3291_v18 = vmov %v391_v58  ;;  %s2359_s19 = sld [smem:[#allocation3 + $0x2]] (%p284_p7) }
  0x89   : >> { %v3286_v60 = vmov %v2249_v20  ;;  %v3287_v61 = vmov %v2252_v21  ;;  %v3288_v23 = vmov %v394_v63  ;;  %v3289_v22 = vmov %v393_v62  ;;  %405 = vrot.lane.b32.xlu0 (%p284_p7), %v3284_v56, %s1946_s21  ;;  %s2361_s14 = sld [smem:[#allocation3 + $0x7]] (%p284_p7) }
  0x8a   : >> { %v3292_v21 = vmov %v3287_v61  ;;  %v3293_v20 = vmov %v3286_v60  ;;  %v3294_v17 = vmov %v3285_v57  ;;  %v3295_v16 = vmov %v3284_v56  ;;  %s2363_s13 = sld [smem:[#allocation3 + $0xc]] (%p284_p7) }
  0x8b   : > { %v2279_v16 = vmul.f32 0.015625, %v391_v58  ;;  %v2283_v0 = vmul.f32 0.015625, %v394_v63  ;;  %v2288_v1 = vmul.f32 0.015625, %v392_v59  ;;  %v2291_v2 = vmul.f32 0.015625, %v393_v62  ;;  %s2365_s2 = sld [smem:[#allocation3 + $0x11]] }
  0x8c   : > { %s2367_s11 = sld [smem:[#allocation3 + $0x16]]  ;;  %v399_v17 = vlaneseq  ;;  %v2392_v20 = vstv %s2318_s6  ;;  %v2395_v21 = vstv %s2321_s0  ;;  %v2406_v3 = vstv %s2323_s9 }
  0x8d   : > { %467 = vrot.lane.b32.xlu1 %v2279_v16, %s1946_s21  ;;  %411 = vrot.lane.b32.xlu0 %v3287_v61, %s1946_s21  ;;  %s2369_s26 = sld [smem:[#allocation3 + $0x1b]]  ;;  %v2409_v4 = vstv %s2325_s27  ;;  %v2412_v5 = vstv %s2327_s12 }
  0x8e   : > { %s2371_s10 = sld [smem:[#allocation3 + $0x20]]  ;;  %v2379_v18 = vand.u32 127, %v399_v17  ;;  %v2387_v19 = vshrl.u32 %v399_v17, 7  ;;  %v2415_v6 = vstv %s2329_s20  ;;  %v2420_v7 = vstv %s2331_s25 }
  0x8f   : > { %s2373_s16 = sld [smem:[#allocation3 + $0x25]]  ;;  %v2423_v8 = vstv %s2333_s4  ;;  %v2426_v9 = vstv %s2335_s30  ;;  %v658_v14 = vstv %s2359_s19  ;;  %v2446_v15 = vstv %s2345_s22 }
  0x90   : > { %s2375_s3 = sld [smem:[#allocation3 + $0x2a]]  ;;  %3300 = vst [vmem:[#allocation34_spill] sm:$0xff] %v2387_v19  ;;  %v2398_v22 = vadd.s32 4294967294, %v2379_v18  ;;  %v2401_v23 = vadd.s32 4294967295, %v2379_v18  ;;  %v2449_v24 = vstv %s2347_s23  ;;  %v2452_v25 = vstv %s2349_s1 }
  0x91   : > { %473 = vrot.lane.b32.xlu1 %v2283_v0, %s1946_s21  ;;  %407 = vrot.lane.b32.xlu0 %v3285_v57, %s1946_s21  ;;  %s2377_s28 = sld [smem:[#allocation3 + $0x2f]]  ;;  %v668_v26 = vstv %s2361_s14  ;;  %v2458_v27 = vstv %s2351_s8  ;;  %v2473_v32 = vmul.f32 %v658_v14, %v3284_v56  ;;  %v2483_v36 = vmul.f32 %v658_v14, %v3287_v61 }
  0x92   : > { %3296 = sst [smem:[#allocation30_spill]] %s2367_s11  ;;  %v2461_v28 = vstv %s2353_s7  ;;  %v2464_v29 = vstv %s2355_s18  ;;  %v678_v30 = vstv %s2363_s13  ;;  %v2470_v31 = vstv %s2357_s17 }
  0x93   : > { %3297 = sst [smem:[#allocation31_spill]] %s2369_s26  ;;  %v688_v33 = vstv %s2365_s2  ;;  %v2480_v35 = vmul.f32 %v668_v26, %v3284_v56  ;;  %3302 = vst [vmem:[#allocation35_spill] sm:$0xff] %v2483_v36  ;;  %v2486_v37 = vmul.f32 %v668_v26, %v3287_v61  ;;  %v2489_v38 = vmul.f32 %v658_v14, %v3285_v57 }
  0x94   : > { %s2381_s15 = sld [smem:[#allocation3 + $0x3]]  ;;  %v2494_v39 = vmul.f32 %v678_v30, %v3284_v56  ;;  %v2497_v40 = vmul.f32 %v678_v30, %v3287_v61  ;;  %v2500_v41 = vmul.f32 %v668_v26, %v3285_v57  ;;  %v2503_v42 = vmul.f32 %v678_v30, %v3285_v57 }
  0x95   : > { %409 = vrot.lane.b32.xlu1 %v3286_v60, %s1946_s21  ;;  %469 = vrot.lane.b32.xlu0 %v2288_v1, %s1946_s21  ;;  %3298 = sst [smem:[#allocation32_spill]] %s2373_s16  ;;  %3304 = vst [vmem:[#allocation36_spill] sm:$0xff] %v2486_v37  ;;  %3305 = vst [vmem:[#allocation37_spill] sm:$0xff] %v2489_v38  ;;  %v2508_v43 = vmul.f32 %v688_v33, %v3284_v56  ;;  %v2514_v45 = vmul.f32 %v688_v33, %v3287_v61  ;;  %vm402_vm0 = vcmp.ge.s32.totalorder %v2398_v22, 0 }
  0x96   : > { %s2383_s26 = sld [smem:[#allocation3 + $0x8]]  ;;  %3307 = vst [vmem:[#allocation38_spill] sm:$0xff] %v2497_v40  ;;  %3308 = vst [vmem:[#allocation39_spill] sm:$0xff] %v2500_v41  ;;  %v2517_v46 = vmul.f32 %v688_v33, %v3285_v57  ;;  %v718_v49 = vstv %s2371_s10  ;;  %v2534_v52 = vmul.f32 %v658_v14, %v3286_v60  ;;  %v738_v53 = vstv %s2375_s3 }
  0x97   : > { %s2385_s11 = sld [smem:[#allocation3 + $0xd]]  ;;  %3309 = vst [vmem:[#allocation40_spill] sm:$0xff] %v2503_v42  ;;  %3310 = vst [vmem:[#allocation41_spill] sm:$0xff] %v2514_v45  ;;  %v748_v54 = vstv %s2377_s28  ;;  %v2541_v55 = vmul.f32 %v668_v26, %v3286_v60  ;;  %v2547_v58 = vmul.f32 %v688_v33, %v3286_v60  ;;  %v2555_v59 = vadd.s32 1, %v2379_v18 }
  0x98   : > { %s2389_s16 = sld [smem:[#allocation3 + $0x12]]  ;;  %3311 = vst [vmem:[#allocation42_spill] sm:$0xff] %v2517_v46  ;;  %3314 = vst [vmem:[#allocation45_spill] sm:$0xff] %v2534_v52  ;;  %v2561_v62 = vmul.f32 %v718_v49, %v2279_v16  ;;  %v2572_v17 = vmul.f32 %v738_v53, %v2279_v16  ;;  %v2575_v14 = vmul.f32 %v748_v54, %v2279_v16  ;;  %vm530_vm1 = vcmp.ge.s32.totalorder %v2401_v23, 0 }
  0x99   : > { %471 = vrot.lane.b32.xlu1 %v2291_v2, %s1946_s21  ;;  %533 = vrot.lane.b32.xlu0 %v3284_v56, %s1947_s29  ;;  %s2337_s21 = sld [smem:[#allocation3 + $0x2d]]  ;;  %3315 = vst [vmem:[#allocation46_spill] sm:$0xff] %v2541_v55  ;;  %3317 = vst [vmem:[#allocation48_spill] sm:$0xff] %v2547_v58  ;;  %v2586_v33 = vmul.f32 %v718_v49, %v2283_v0  ;;  %v2603_v58 = vmul.f32 %v748_v54, %v2283_v0  ;;  %vm759_vm2 = vcmp.lt.s32.totalorder %v2555_v59, 128 }
  0x9a   : > { %s2417_s6 = sld [smem:[#allocation3 + $0x1c]]  ;;  %3321 = vst [vmem:[#allocation51_spill] sm:$0xff] %v2561_v62  ;;  %3324 = vst [vmem:[#allocation54_spill] sm:$0xff] %v2572_v17 }
  0x9b   : > { %s2431_s0 = sld [smem:[#allocation3 + $0x21]]  ;;  %3325 = vst [vmem:[#allocation55_spill] sm:$0xff] %v2575_v14  ;;  %3328 = vst [vmem:[#allocation58_spill] sm:$0xff] %v2586_v33 }
  0x9c   : > { %s3301_s9 = sld [smem:[#allocation30_spill]]  ;;  %3333 = vst [vmem:[#allocation63_spill] sm:$0xff] %v2603_v58 }
  0x9d   : > { %539 = vrot.lane.b32.xlu1 %v3287_v61, %s1947_s29  ;;  %535 = vrot.lane.b32.xlu0 %v3285_v57, %s1947_s29  ;;  %3299 = sst [smem:[#allocation33_spill]] %s2385_s11 }
  0x9e   : > { %s2403_s11 = sld [smem:[#allocation3 + $0x17]] }
  0x9f   : > { %v2429_v10 = vstv %s2337_s21  ;;  %s2443_s27 = sld [smem:[#allocation3 + $0x26]] }
  0xa0   : > { %s2455_s12 = sld [smem:[#allocation3 + $0x2b]] }
  0xa1   : > { %537 = vrot.lane.b32.xlu1 %v3286_v60, %s1947_s29  ;;  %595 = vrot.lane.b32.xlu0 %v2279_v16, %s1947_s29  ;;  %s2467_s20 = sld [smem:[#allocation3 + $0x30]] }
  0xa2   : > { %v698_v34 = vstv %s3301_s9  ;;  %s2477_s1 = sld [smem:[#allocation3 + $0x4]] }
  0xa3   : > { %s3303_s14 = sld [smem:[#allocation31_spill]]  ;;  %v2511_v44 = vmul.f32 %v698_v34, %v3284_v56  ;;  %v2523_v47 = vmul.f32 %v698_v34, %v3287_v61  ;;  %v2531_v51 = vmul.f32 %v698_v34, %v3285_v57 }
  0xa4   : > { %s3306_s13 = sld [smem:[#allocation32_spill]] }
  0xa5   : > { %601 = vrot.lane.b32.xlu1 %v2283_v0, %s1947_s29  ;;  %597 = vrot.lane.b32.xlu0 %v2288_v1, %s1947_s29  ;;  %s2491_s17 = sld [smem:[#allocation3 + $0x9]]  ;;  %3312 = vst [vmem:[#allocation43_spill] sm:$0xff] %v2523_v47  ;;  %3313 = vst [vmem:[#allocation44_spill] sm:$0xff] %v2531_v51 }
  0xa6   : > { %s2505_s2 = sld [smem:[#allocation3 + $0xe]] }
  0xa7   : > { %s2519_s18 = sld [smem:[#allocation3 + $0x13]] }
  0xa8   : > { %s2528_s19 = sld [smem:[#allocation3 + $0x18]] }
  0xa9   : > { %599 = vrot.lane.b32.xlu1 %v2291_v2, %s1947_s29  ;;  %761 = vrot.lane.b32.xlu0 %v3284_v56, %s1948_s5  ;;  %s2339_s29 = sld [smem:[#allocation3 + $0x1]]  ;;  %v708_v48 = vstv %s3303_s14 }
  0xaa   : > { %v728_v50 = vstv %s3306_s13  ;;  %s2538_s7 = sld [smem:[#allocation3 + $0x1d]]  ;;  %v2578_v26 = vmul.f32 %v708_v48, %v2283_v0  ;;  %v2606_v33 = vmul.f32 %v708_v48, %v2288_v1  ;;  %v2624_v58 = vmul.f32 %v708_v48, %v2291_v2 }
  0xab   : > { %s2552_s10 = sld [smem:[#allocation3 + $0x22]]  ;;  %v2564_v63 = vmul.f32 %v728_v50, %v2279_v16  ;;  %v2615_v14 = vmul.f32 %v728_v50, %v2288_v1 }
  0xac   : > { %s3319_s8 = sld [smem:[#allocation33_spill]]  ;;  %3326 = vst [vmem:[#allocation56_spill] sm:$0xff] %v2578_v26  ;;  %v2600_v26 = vstv %s2389_s16  ;;  %3334 = vst [vmem:[#allocation64_spill] sm:$0xff] %v2606_v33  ;;  %v2627_v33 = vmul.f32 %v718_v49, %v2291_v2 }
  0xad   : > { %767 = vrot.lane.b32.xlu1 %v3287_v61, %s1948_s5  ;;  %763 = vrot.lane.b32.xlu0 %v3285_v57, %s1948_s5  ;;  %3322 = vst [vmem:[#allocation52_spill] sm:$0xff] %v2564_v63  ;;  %s2566_s28 = sld [smem:[#allocation3 + $0x27]]  ;;  %3332 = vst [vmem:[#allocation62_spill] sm:$0xff] %v2600_v26 }
  0xae   : > { %s2580_s22 = sld [smem:[#allocation3 + $0x2c]]  ;;  %3337 = vst [vmem:[#allocation67_spill] sm:$0xff] %v2615_v14  ;;  %3340 = vst [vmem:[#allocation70_spill] sm:$0xff] %v2624_v58  ;;  %v2633_v14 = vmul.f32 %v738_v53, %v2291_v2 }
  0xaf   : > { %v2434_v11 = vstv %s2339_s29  ;;  %3341 = vst [vmem:[#allocation71_spill] sm:$0xff] %v2627_v33  ;;  %v2645_v33 = vstv %s2443_s27 }
  0xb0   : > { %3343 = vst [vmem:[#allocation73_spill] sm:$0xff] %v2633_v14  ;;  %3347 = vst [vmem:[#allocation77_spill] sm:$0xff] %v2645_v33  ;;  %v2668_v14 = vstv %s2519_s18  ;;  %v2671_v33 = vstv %s2528_s19 }
  0xb1   : > { %765 = vrot.lane.b32.xlu1 %v3286_v60, %s1948_s5  ;;  %823 = vrot.lane.b32.xlu0 %v2279_v16, %s1948_s5  ;;  %3354 = vst [vmem:[#allocation84_spill] sm:$0xff] %v2668_v14  ;;  %3355 = vst [vmem:[#allocation85_spill] sm:$0xff] %v2671_v33  ;;  %v1017_v14 = vadd.s32 24, %v2387_v19  ;;  %v2693_v33 = vadd.s32 4294967294, %v2387_v19 }
  0xb3   : > { %3361 = vst [vmem:[#allocation91_spill] sm:$0xff] %v2693_v33  ;;  %v2724_v51 = vadd.s32 1, %v1017_v14 }
  0xb5   : > { %829 = vrot.lane.b32.xlu1 %v2283_v0, %s1948_s5  ;;  %825 = vrot.lane.b32.xlu0 %v2288_v1, %s1948_s5  ;;  %3363 = vst [vmem:[#allocation93_spill] sm:$0xff] %v2724_v51 }
  0xb9   : > { %827 = vrot.lane.b32.xlu1 %v2291_v2, %s1948_s5  ;;  %889 = vrot.lane.b32.xlu0 %v3284_v56, %s1949_s24  ;;  %s2341_s5 = sld [smem:[#allocation3 + $0x6]]  ;;  %v2544_v56 = vmul.f32 %v678_v30, %v3286_v60  ;;  %v2583_v30 = vstv %s2383_s26 }
  0xba   : > { %3327 = vst [vmem:[#allocation57_spill] sm:$0xff] %v2583_v30 }
  0xbb   : > { %3316 = vst [vmem:[#allocation47_spill] sm:$0xff] %v2544_v56 }
  0xbd   : > { %895 = vrot.lane.b32.xlu1 %v3287_v61, %s1949_s24  ;;  %891 = vrot.lane.b32.xlu0 %v3285_v57, %s1949_s24  ;;  %v2550_v57 = vmul.f32 %v698_v34, %v3286_v60  ;;  %v2558_v61 = vmul.f32 %v708_v48, %v2279_v16  ;;  %v2589_v34 = vmul.f32 %v728_v50, %v2283_v0  ;;  %v2642_v48 = vstv %s2431_s0 }
  0xbe   : > { %3346 = vst [vmem:[#allocation76_spill] sm:$0xff] %v2642_v48  ;;  %v2662_v48 = vstv %s2491_s17 }
  0xbf   : > { %v2437_v12 = vstv %s2341_s5  ;;  %3318 = vst [vmem:[#allocation49_spill] sm:$0xff] %v2550_v57  ;;  %3320 = vst [vmem:[#allocation50_spill] sm:$0xff] %v2558_v61  ;;  %v2592_v57 = vmul.f32 %v738_v53, %v2283_v0 }
  0xc0   : > { %3329 = vst [vmem:[#allocation59_spill] sm:$0xff] %v2589_v34  ;;  %v2609_v34 = vstv %s2403_s11  ;;  %3352 = vst [vmem:[#allocation82_spill] sm:$0xff] %v2662_v48 }
  0xc1   : > { %893 = vrot.lane.b32.xlu1 %v3286_v60, %s1949_s24  ;;  %951 = vrot.lane.b32.xlu0 %v2279_v16, %s1949_s24  ;;  %v2569_v60 = vstv %s2381_s15  ;;  %3330 = vst [vmem:[#allocation60_spill] sm:$0xff] %v2592_v57  ;;  %s2594_s15 = sld [smem:[#allocation3 + $0x31]]  ;;  %v2597_v16 = vstv %s3319_s8  ;;  %3335 = vst [vmem:[#allocation65_spill] sm:$0xff] %v2609_v34  ;;  %v2612_v57 = vmul.f32 %v718_v49, %v2288_v1 }
  0xc2   : > { %3323 = vst [vmem:[#allocation53_spill] sm:$0xff] %v2569_v60  ;;  %3331 = vst [vmem:[#allocation61_spill] sm:$0xff] %v2597_v16  ;;  %v2618_v16 = vmul.f32 %v738_v53, %v2288_v1  ;;  %v2654_v53 = vadd.s32 2, %v2379_v18 }
  0xc3   : > { %3336 = vst [vmem:[#allocation66_spill] sm:$0xff] %v2612_v57  ;;  %v2630_v57 = vmul.f32 %v728_v50, %v2291_v2  ;;  %v2648_v50 = vstv %s2455_s12 }
  0xc4   : > { %3338 = vst [vmem:[#allocation68_spill] sm:$0xff] %v2618_v16  ;;  %3348 = vst [vmem:[#allocation78_spill] sm:$0xff] %v2648_v50  ;;  %v2674_v50 = vstv %s2538_s7 }
  0xc5   : > { %957 = vrot.lane.b32.xlu1 %v2283_v0, %s1949_s24  ;;  %953 = vrot.lane.b32.xlu0 %v2288_v1, %s1949_s24  ;;  %v2621_v0 = vmul.f32 %v748_v54, %v2288_v1  ;;  %3342 = vst [vmem:[#allocation72_spill] sm:$0xff] %v2630_v57  ;;  %v2636_v1 = vmul.f32 %v748_v54, %v2291_v2  ;;  %v2651_v57 = vstv %s2467_s20  ;;  %3350 = vst [vmem:[#allocation80_spill] sm:$0xff] %v2654_v53 }
  0xc6   : > { %3349 = vst [vmem:[#allocation79_spill] sm:$0xff] %v2651_v57  ;;  %3356 = vst [vmem:[#allocation86_spill] sm:$0xff] %v2674_v50  ;;  %v2677_v57 = vstv %s2552_s10  ;;  %v2682_v53 = vstv %s2566_s28  ;;  %v2696_v50 = vadd.s32 4294967295, %v2387_v19 }
  0xc7   : > { %3339 = vst [vmem:[#allocation69_spill] sm:$0xff] %v2621_v0  ;;  %3344 = vst [vmem:[#allocation74_spill] sm:$0xff] %v2636_v1  ;;  %v2639_v0 = vstv %s2417_s6  ;;  %v2659_v1 = vstv %s2477_s1 }
  0xc8   : > { %3345 = vst [vmem:[#allocation75_spill] sm:$0xff] %v2639_v0  ;;  %3351 = vst [vmem:[#allocation81_spill] sm:$0xff] %v2659_v1  ;;  %v2665_v0 = vstv %s2505_s2  ;;  %v2688_v1 = vstv %s2594_s15 }
  0xc9   : > { %955 = vrot.lane.b32.xlu1 %v2291_v2, %s1949_s24  ;;  %s2343_s24 = sld [smem:[#allocation3 + $0xb]]  ;;  %3353 = vst [vmem:[#allocation83_spill] sm:$0xff] %v2665_v0  ;;  %3357 = vst [vmem:[#allocation87_spill] sm:$0xff] %v2677_v57 }
  0xca   : > { %3358 = vst [vmem:[#allocation88_spill] sm:$0xff] %v2682_v53  ;;  %3360 = vst [vmem:[#allocation90_spill] sm:$0xff] %v2688_v1 }
  0xcb   : > { %3362 = vst [vmem:[#allocation92_spill] sm:$0xff] %v2696_v50 }
  0xcf   : > { %v2440_v13 = vstv %s2343_s24 }
  0xfb   : > { %v406_v49 = vpop.permute.xlu0 %405 }
  0xfc   : > { %v413_v2 = vsel %vm402_vm0, %v406_v49, 0.0  ;;  %v2685_v49 = vstv %s2580_s22 }
  0xfd   : > { %3359 = vst [vmem:[#allocation89_spill] sm:$0xff] %v2685_v49  ;;  %v419_v48 = vmul.f32 %v2392_v20, %v413_v2  ;;  %v429_v57 = vmul.f32 %v2395_v21, %v413_v2  ;;  %v449_v53 = vmul.f32 %v2409_v4, %v413_v2  ;;  %v459_v58 = vmul.f32 %v2412_v5, %v413_v2 }
  0xff   : > { %v468_v54 = vpop.permute.xlu1 %467  ;;  %v412_v0 = vpop.permute.xlu0 %411 }
 0x100   : > { %v475_v18 = vsel %vm402_vm0, %v468_v54, 0.0  ;;  %v439_v54 = vmul.f32 %v2406_v3, %v413_v2  ;;  %v416_v1 = vsel %vm402_vm0, %v412_v0, 0.0 }
 0x101   : > { %v481_v16 = vmul.f32 %v2415_v6, %v475_v18  ;;  %v491_v34 = vmul.f32 %v2420_v7, %v475_v18  ;;  %v501_v33 = vmul.f32 %v2423_v8, %v475_v18  ;;  %v511_v50 = vmul.f32 %v2426_v9, %v475_v18 }
 0x102   : > { %v521_v19 = vmul.f32 %v2429_v10, %v475_v18  ;;  %v422_v26 = vmul.f32 %v2392_v20, %v416_v1  ;;  %v432_v30 = vmul.f32 %v2395_v21, %v416_v1  ;;  %v442_v60 = vmul.f32 %v2406_v3, %v416_v1 }
 0x103   : > { %v474_v49 = vpop.permute.xlu1 %473  ;;  %v452_v0 = vmul.f32 %v2409_v4, %v416_v1  ;;  %v462_v2 = vmul.f32 %v2412_v5, %v416_v1  ;;  %v408_v56 = vpop.permute.xlu0 %407  ;;  %v485_v46 = vadd.f32 %v481_v16, %v419_v48  ;;  %v495_v42 = vadd.f32 %v491_v34, %v429_v57 }
 0x104   : > { %v478_v17 = vsel %vm402_vm0, %v474_v49, 0.0  ;;  %v414_v1 = vsel %vm402_vm0, %v408_v56, 0.0  ;;  %v2726_v49 = vadd.s32 2, %v1017_v14  ;;  %v505_v41 = vadd.f32 %v501_v33, %v439_v54 }
 0x105   : > { %v484_v63 = vmul.f32 %v2415_v6, %v478_v17  ;;  %v494_v18 = vmul.f32 %v2420_v7, %v478_v17  ;;  %v504_v62 = vmul.f32 %v2423_v8, %v478_v17  ;;  %v514_v55 = vmul.f32 %v2426_v9, %v478_v17 }
 0x106   : > { %v524_v52 = vmul.f32 %v2429_v10, %v478_v17  ;;  %v515_v38 = vadd.f32 %v511_v50, %v449_v53  ;;  %v525_v47 = vadd.f32 %v521_v19, %v459_v58  ;;  %v420_v14 = vmul.f32 %v2392_v20, %v414_v1 }
 0x107   : > { %v410_v61 = vpop.permute.xlu1 %409  ;;  %v2728_v45 = vadd.f32 %v484_v63, %v422_v26  ;;  %v2730_v40 = vadd.f32 %v494_v18, %v432_v30  ;;  %v470_v17 = vpop.permute.xlu0 %469  ;;  %v2734_v36 = vadd.f32 %v504_v62, %v442_v60  ;;  %v2736_v56 = vadd.f32 %v514_v55, %v452_v0 }
 0x108   : > { %v415_v37 = vsel %vm402_vm0, %v410_v61, 0.0  ;;  %v2738_v51 = vadd.f32 %v524_v52, %v462_v2  ;;  %v430_v33 = vmul.f32 %v2395_v21, %v414_v1  ;;  %v440_v19 = vmul.f32 %v2406_v3, %v414_v1 }
 0x109   : > { %v450_v58 = vmul.f32 %v2409_v4, %v414_v1  ;;  %v476_v63 = vsel %vm402_vm0, %v470_v17, 0.0  ;;  %v460_v61 = vmul.f32 %v2412_v5, %v414_v1  ;;  %v421_v62 = vmul.f32 %v2392_v20, %v415_v37 }
 0x10a   : > { %v482_v55 = vmul.f32 %v2415_v6, %v476_v63  ;;  %v492_v52 = vmul.f32 %v2420_v7, %v476_v63  ;;  %v431_v60 = vmul.f32 %v2395_v21, %v415_v37  ;;  %v502_v26 = vmul.f32 %v2423_v8, %v476_v63 }
 0x10b   : > { %v472_v57 = vpop.permute.xlu1 %471  ;;  %v512_v30 = vmul.f32 %v2426_v9, %v476_v63  ;;  %v534_v16 = vpop.permute.xlu0 %533  ;;  %v441_v48 = vmul.f32 %v2406_v3, %v415_v37  ;;  %v451_v50 = vmul.f32 %v2409_v4, %v415_v37  ;;  %v461_v20 = vmul.f32 %v2412_v5, %v415_v37 }
 0x10c   : > { %v477_v34 = vsel %vm402_vm0, %v472_v57, 0.0  ;;  %v522_v53 = vmul.f32 %v2429_v10, %v476_v63  ;;  %v486_v0 = vadd.f32 %v482_v55, %v420_v14  ;;  %v496_v1 = vadd.f32 %v492_v52, %v430_v33 }
 0x10d   : > { %v483_v21 = vmul.f32 %v2415_v6, %v477_v34  ;;  %v493_v2 = vmul.f32 %v2420_v7, %v477_v34  ;;  %v503_v18 = vmul.f32 %v2423_v8, %v477_v34  ;;  %v513_v22 = vmul.f32 %v2426_v9, %v477_v34 }
 0x10e   : > { %v523_v17 = vmul.f32 %v2429_v10, %v477_v34  ;;  %v541_v3 = vsel %vm530_vm1, %v534_v16, 0.0  ;;  %v506_v4 = vadd.f32 %v502_v26, %v440_v19  ;;  %v516_v5 = vadd.f32 %v512_v30, %v450_v58 }
 0x10f   : > { %v540_v54 = vpop.permute.xlu1 %539  ;;  %v547_v37 = vmul.f32 %v2434_v11, %v541_v3  ;;  %v536_v6 = vpop.permute.xlu0 %535  ;;  %v526_v57 = vadd.f32 %v522_v53, %v460_v61  ;;  %v487_v7 = vadd.f32 %v483_v21, %v421_v62  ;;  %v557_v8 = vmul.f32 %v2437_v12, %v541_v3 }
 0x110   : > { %v544_v14 = vsel %vm530_vm1, %v540_v54, 0.0  ;;  %v567_v33 = vmul.f32 %v2440_v13, %v541_v3  ;;  %v497_v9 = vadd.f32 %v493_v2, %v431_v60  ;;  %v507_v63 = vadd.f32 %v503_v18, %v441_v48 }
 0x111   : > { %v577_v10 = vmul.f32 %v2446_v15, %v541_v3  ;;  %v587_v55 = vmul.f32 %v2449_v24, %v541_v3  ;;  %v517_v19 = vadd.f32 %v513_v22, %v451_v50  ;;  %v527_v58 = vadd.f32 %v523_v17, %v461_v20 }
 0x112   : > { %v551_v52 = vadd.f32 %v547_v37, %v485_v46  ;;  %v550_v26 = vmul.f32 %v2434_v11, %v544_v14  ;;  %v561_v34 = vadd.f32 %v557_v8, %v495_v42  ;;  %v560_v61 = vmul.f32 %v2437_v12, %v544_v14 }
 0x113   : > { %v538_v30 = vpop.permute.xlu1 %537  ;;  %v570_v62 = vmul.f32 %v2440_v13, %v544_v14  ;;  %v580_v16 = vmul.f32 %v2446_v15, %v544_v14  ;;  %v571_v53 = vadd.f32 %v567_v33, %v505_v41  ;;  %v581_v60 = vadd.f32 %v577_v10, %v515_v38  ;;  %v596_v21 = vpop.permute.xlu0 %595 }
 0x114   : > { %v590_v48 = vmul.f32 %v2449_v24, %v544_v14  ;;  %v542_v54 = vsel %vm530_vm1, %v536_v6, 0.0  ;;  %v591_v50 = vadd.f32 %v587_v55, %v525_v47  ;;  %v554_v2 = vadd.f32 %v550_v26, %v2728_v45 }
 0x115   : > { %v548_v46 = vmul.f32 %v2434_v11, %v542_v54  ;;  %v558_v20 = vmul.f32 %v2437_v12, %v542_v54  ;;  %v568_v42 = vmul.f32 %v2440_v13, %v542_v54  ;;  %v578_v18 = vmul.f32 %v2446_v15, %v542_v54 }
 0x116   : > { %v588_v41 = vmul.f32 %v2449_v24, %v542_v54  ;;  %v543_v38 = vsel %vm530_vm1, %v538_v30, 0.0  ;;  %v564_v22 = vadd.f32 %v560_v61, %v2730_v40  ;;  %v574_v47 = vadd.f32 %v570_v62, %v2734_v36 }
 0x117   : > { %v584_v17 = vadd.f32 %v580_v16, %v2736_v56  ;;  %v549_v3 = vmul.f32 %v2434_v11, %v543_v38  ;;  %v594_v37 = vadd.f32 %v590_v48, %v2738_v51  ;;  %v552_v14 = vadd.f32 %v548_v46, %v486_v0  ;;  %v602_v8 = vpop.permute.xlu1 %601 }
 0x118   : > { %v562_v6 = vadd.f32 %v558_v20, %v496_v1  ;;  %v572_v45 = vadd.f32 %v568_v42, %v506_v4  ;;  %v582_v33 = vadd.f32 %v578_v18, %v516_v5  ;;  %v592_v10 = vadd.f32 %v588_v41, %v526_v57  ;;  %v598_v5 = vpop.permute.xlu0 %597 }
 0x119   : > { %v559_v55 = vmul.f32 %v2437_v12, %v543_v38  ;;  %v603_v26 = vsel %vm530_vm1, %v596_v21, 0.0  ;;  %v569_v40 = vmul.f32 %v2440_v13, %v543_v38  ;;  %v579_v36 = vmul.f32 %v2446_v15, %v543_v38 }
 0x11a   : > { %v609_v56 = vmul.f32 %v2452_v25, %v603_v26  ;;  %v619_v11 = vmul.f32 %v2458_v27, %v603_v26  ;;  %v553_v51 = vadd.f32 %v549_v3, %v487_v7  ;;  %v589_v0 = vmul.f32 %v2449_v24, %v543_v38 }
 0x11b   : > { %v629_v1 = vmul.f32 %v2461_v28, %v603_v26  ;;  %v639_v4 = vmul.f32 %v2464_v29, %v603_v26  ;;  %v649_v30 = vmul.f32 %v2470_v31, %v603_v26  ;;  %v606_v13 = vsel %vm530_vm1, %v602_v8, 0.0  ;;  %v600_v46 = vpop.permute.xlu1 %599  ;;  %v3364_v8 = vld [vmem:[#allocation35_spill] sm:$0xff] }
 0x11c   : > { %v613_v12 = vadd.f32 %v609_v56, %v551_v52  ;;  %v623_v57 = vadd.f32 %v619_v11, %v561_v34  ;;  %v612_v62 = vmul.f32 %v2452_v25, %v606_v13  ;;  %v622_v7 = vmul.f32 %v2458_v27, %v606_v13 }
 0x11d   : > { %v633_v15 = vadd.f32 %v629_v1, %v571_v53  ;;  %v643_v61 = vadd.f32 %v639_v4, %v581_v60  ;;  %v563_v16 = vadd.f32 %v559_v55, %v497_v9  ;;  %v573_v24 = vadd.f32 %v569_v40, %v507_v63  ;;  %v3366_v4 = vld [vmem:[#allocation38_spill] sm:$0xff] }
 0x11e   : > { %v583_v48 = vadd.f32 %v579_v36, %v517_v19  ;;  %v632_v54 = vmul.f32 %v2461_v28, %v606_v13  ;;  %v593_v20 = vadd.f32 %v589_v0, %v527_v58  ;;  %v653_v52 = vadd.f32 %v649_v30, %v591_v50  ;;  %v762_v58 = vpop.permute.xlu0 %761  ;;  %v3365_v36 = vld [vmem:[#allocation36_spill] sm:$0xff] }
 0x11f   : > { %v663_v34 = vadd.f32 %v2473_v32, %v613_v12  ;;  %v673_v42 = vadd.f32 %v2480_v35, %v623_v57  ;;  %v683_v21 = vadd.f32 %v2494_v39, %v633_v15  ;;  %v616_v53 = vadd.f32 %v612_v62, %v554_v2  ;;  %v3367_v12 = vld [vmem:[#allocation41_spill] sm:$0xff]  ;;  %v3368_v57 = vld [vmem:[#allocation43_spill] sm:$0xff]  ;;  %v3372_v62 = vld [vmem:[#allocation42_spill] sm:$0xff] }
 0x120   : > { %v642_v60 = vmul.f32 %v2464_v29, %v606_v13  ;;  %v652_v18 = vmul.f32 %v2470_v31, %v606_v13  ;;  %v693_v9 = vadd.f32 %v2508_v43, %v643_v61  ;;  %v626_v63 = vadd.f32 %v622_v7, %v564_v22  ;;  %v3370_v15 = vld [vmem:[#allocation39_spill] sm:$0xff]  ;;  %v3371_v61 = vld [vmem:[#allocation40_spill] sm:$0xff] }
 0x121   : > { %v604_v19 = vsel %vm530_vm1, %v598_v5, 0.0  ;;  %v605_v32 = vsel %vm530_vm1, %v600_v46, 0.0  ;;  %v636_v35 = vadd.f32 %v632_v54, %v574_v47  ;;  %v703_v22 = vadd.f32 %v2511_v44, %v653_v52  ;;  %v3373_v54 = vld [vmem:[#allocation44_spill] sm:$0xff] }
 0x122   : > { %v646_v50 = vadd.f32 %v642_v60, %v584_v17  ;;  %v656_v39 = vadd.f32 %v652_v18, %v594_v37  ;;  %v610_v2 = vmul.f32 %v2452_v25, %v604_v19  ;;  %v620_v41 = vmul.f32 %v2458_v27, %v604_v19  ;;  %v3374_v60 = vld [vmem:[#allocation45_spill] sm:$0xff] }
 0x123   : > { %v630_v38 = vmul.f32 %v2461_v28, %v604_v19  ;;  %v640_v3 = vmul.f32 %v2464_v29, %v604_v19  ;;  %v650_v43 = vmul.f32 %v2470_v31, %v604_v19  ;;  %v666_v55 = vadd.f32 %v3364_v8, %v616_v53  ;;  %v3383_v8 = vld [vmem:[#allocation55_spill] sm:$0xff] }
 0x124   : > { %v614_v23 = vadd.f32 %v610_v2, %v552_v14  ;;  %v611_v26 = vmul.f32 %v2452_v25, %v605_v32  ;;  %v624_v47 = vadd.f32 %v620_v41, %v562_v6  ;;  %v676_v56 = vadd.f32 %v3365_v36, %v626_v63  ;;  %v3369_v14 = vld [vmem:[#allocation37_spill] sm:$0xff]  ;;  %v768_v25 = vpop.permute.xlu1 %767  ;;  %v764_v6 = vpop.permute.xlu0 %763  ;;  %v3375_v63 = vld [vmem:[#allocation50_spill] sm:$0xff]  ;;  %v3387_v36 = vld [vmem:[#allocation48_spill] sm:$0xff] }
 0x125   : > { %v634_v17 = vadd.f32 %v630_v38, %v572_v45  ;;  %v644_v37 = vadd.f32 %v640_v3, %v582_v33  ;;  %v654_v40 = vadd.f32 %v650_v43, %v592_v10  ;;  %v621_v0 = vmul.f32 %v2458_v27, %v605_v32  ;;  %v3380_v41 = vld [vmem:[#allocation54_spill] sm:$0xff]  ;;  %v3381_v3 = vld [vmem:[#allocation53_spill] sm:$0xff] }
 0x126   : > { %v615_v11 = vadd.f32 %v611_v26, %v553_v51  ;;  %v631_v1 = vmul.f32 %v2461_v28, %v605_v32  ;;  %v686_v5 = vadd.f32 %v3366_v4, %v636_v35  ;;  %v696_v44 = vadd.f32 %v3367_v12, %v646_v50  ;;  %v3377_v35 = vld [vmem:[#allocation51_spill] sm:$0xff]  ;;  %v3378_v50 = vld [vmem:[#allocation52_spill] sm:$0xff]  ;;  %v3390_v4 = vld [vmem:[#allocation58_spill] sm:$0xff] }
 0x127   : > { %v706_v30 = vadd.f32 %v3368_v57, %v656_v39  ;;  %v664_v13 = vadd.f32 %v3369_v14, %v614_v23  ;;  %v625_v45 = vadd.f32 %v621_v0, %v563_v16  ;;  %v641_v10 = vmul.f32 %v2464_v29, %v605_v32  ;;  %v3376_v16 = vld [vmem:[#allocation46_spill] sm:$0xff]  ;;  %v3379_v39 = vld [vmem:[#allocation47_spill] sm:$0xff] }
 0x128   : > { %v635_v33 = vadd.f32 %v631_v1, %v573_v24  ;;  %v651_v51 = vmul.f32 %v2470_v31, %v605_v32  ;;  %v674_v27 = vadd.f32 %v3370_v15, %v624_v47  ;;  %v684_v28 = vadd.f32 %v3371_v61, %v634_v17  ;;  %v3385_v47 = vld [vmem:[#allocation62_spill] sm:$0xff]  ;;  %v3389_v1 = vld [vmem:[#allocation56_spill] sm:$0xff] }
 0x129   : > { %v694_v7 = vadd.f32 %v3372_v62, %v644_v37  ;;  %v704_v46 = vadd.f32 %v3373_v54, %v654_v40  ;;  %v645_v52 = vadd.f32 %v641_v10, %v583_v48  ;;  %v665_v18 = vadd.f32 %v3374_v60, %v615_v11  ;;  %v824_v40 = vpop.permute.xlu0 %823  ;;  %v3388_v11 = vld [vmem:[#allocation49_spill] sm:$0xff]  ;;  %v3394_v60 = vld [vmem:[#allocation64_spill] sm:$0xff] }
 0x12a   : > { %v655_v53 = vadd.f32 %v651_v51, %v593_v20  ;;  %v713_v19 = vadd.f32 %v3375_v63, %v663_v34  ;;  %v675_v24 = vadd.f32 %v3376_v16, %v625_v45  ;;  %v723_v29 = vadd.f32 %v3377_v35, %v673_v42  ;;  %v3382_v20 = vld [vmem:[#allocation57_spill] sm:$0xff]  ;;  %v3395_v16 = vld [vmem:[#allocation66_spill] sm:$0xff] }
 0x12b   : > { %v733_v31 = vadd.f32 %v3378_v50, %v683_v21  ;;  %v769_v32 = vsel %vm759_vm2, %v762_v58, 0.0  ;;  %v685_v2 = vadd.f32 %v3379_v39, %v635_v33  ;;  %v743_v38 = vadd.f32 %v3380_v41, %v693_v9  ;;  %v3384_v34 = vld [vmem:[#allocation61_spill] sm:$0xff]  ;;  %v766_v21 = vpop.permute.xlu1 %765  ;;  %v3392_v33 = vld [vmem:[#allocation60_spill] sm:$0xff] }
 0x12c   : > { %v775_v48 = vmul.f32 %v3381_v3, %v769_v32  ;;  %v785_v43 = vmul.f32 %v3382_v20, %v769_v32  ;;  %v753_v23 = vadd.f32 %v3383_v8, %v703_v22  ;;  %v795_v26 = vmul.f32 %v3384_v34, %v769_v32  ;;  %v3386_v42 = vld [vmem:[#allocation65_spill] sm:$0xff]  ;;  %v3391_v22 = vld [vmem:[#allocation59_spill] sm:$0xff] }
 0x12d   : > { %v805_v17 = vmul.f32 %v3385_v47, %v769_v32  ;;  %v815_v37 = vmul.f32 %v3386_v42, %v769_v32  ;;  %v695_v58 = vadd.f32 %v3387_v36, %v645_v52  ;;  %v705_v0 = vadd.f32 %v3388_v11, %v655_v53  ;;  %v826_v41 = vpop.permute.xlu0 %825 }
 0x12e   : > { %v716_v9 = vadd.f32 %v3389_v1, %v666_v55  ;;  %v726_v12 = vadd.f32 %v3390_v4, %v676_v56  ;;  %v2860_v57 = vadd.f32 %v775_v48, %v713_v19  ;;  %v2862_v14 = vadd.f32 %v785_v43, %v723_v29  ;;  %v3393_v55 = vld [vmem:[#allocation63_spill] sm:$0xff] }
 0x12f   : > { %v736_v45 = vadd.f32 %v3391_v22, %v686_v5  ;;  %v746_v10 = vadd.f32 %v3392_v33, %v696_v44  ;;  %v2866_v51 = vadd.f32 %v795_v26, %v733_v31  ;;  %v2868_v15 = vadd.f32 %v805_v17, %v743_v38  ;;  %v3398_v31 = vld [vmem:[#allocation69_spill] sm:$0xff]  ;;  %v830_v39 = vpop.permute.xlu1 %829  ;;  %v3402_v22 = vld [vmem:[#allocation80_spill] sm:$0xff] }
 0x130   : > { %v2870_v61 = vadd.f32 %v815_v37, %v753_v23  ;;  %v772_v62 = vsel %vm759_vm2, %v768_v25, 0.0  ;;  %v756_v54 = vadd.f32 %v3393_v55, %v706_v30  ;;  %v714_v63 = vadd.f32 %v3394_v60, %v664_v13  ;;  %v3396_v25 = vld [vmem:[#allocation67_spill] sm:$0xff]  ;;  %v3397_v30 = vld [vmem:[#allocation68_spill] sm:$0xff] }
 0x131   : > { %v778_v56 = vmul.f32 %v3381_v3, %v772_v62  ;;  %v788_v52 = vmul.f32 %v3382_v20, %v772_v62  ;;  %v798_v53 = vmul.f32 %v3384_v34, %v772_v62  ;;  %v808_v5 = vmul.f32 %v3385_v47, %v772_v62 }
 0x132   : > { %v818_v44 = vmul.f32 %v3386_v42, %v772_v62  ;;  %v770_v19 = vsel %vm759_vm2, %v764_v6, 0.0  ;;  %v724_v35 = vadd.f32 %v3395_v16, %v674_v27  ;;  %v734_v29 = vadd.f32 %v3396_v25, %v684_v28  ;;  %v3408_v25 = vld [vmem:[#allocation78_spill] sm:$0xff] }
 0x133   : > { %v744_v50 = vadd.f32 %v3397_v30, %v694_v7  ;;  %v754_v32 = vadd.f32 %v3398_v31, %v704_v46  ;;  %v782_v38 = vadd.f32 %v778_v56, %v716_v9  ;;  %v776_v48 = vmul.f32 %v3381_v3, %v770_v19  ;;  %v3399_v7 = vld [vmem:[#allocation70_spill] sm:$0xff]  ;;  %v3400_v46 = vld [vmem:[#allocation71_spill] sm:$0xff]  ;;  %v3401_v9 = vld [vmem:[#allocation72_spill] sm:$0xff] }
 0x134   : > { %v786_v43 = vmul.f32 %v3382_v20, %v770_v19  ;;  %v796_v13 = vmul.f32 %v3384_v34, %v770_v19  ;;  %v792_v8 = vadd.f32 %v788_v52, %v726_v12  ;;  %v802_v23 = vadd.f32 %v798_v53, %v736_v45  ;;  %v3403_v56 = vld [vmem:[#allocation73_spill] sm:$0xff] }
 0x135   : > { %v806_v6 = vmul.f32 %v3385_v47, %v770_v19  ;;  %v816_v27 = vmul.f32 %v3386_v42, %v770_v19  ;;  %v812_v28 = vadd.f32 %v808_v5, %v746_v10  ;;  %v822_v26 = vadd.f32 %v818_v44, %v756_v54  ;;  %v828_v54 = vpop.permute.xlu1 %827  ;;  %v3404_v5 = vld [vmem:[#allocation75_spill] sm:$0xff] }
 0x136   : > { %v715_v17 = vadd.f32 %v3399_v7, %v665_v18  ;;  %v725_v37 = vadd.f32 %v3400_v46, %v675_v24  ;;  %v780_v36 = vadd.f32 %v776_v48, %v714_v63  ;;  %v790_v11 = vadd.f32 %v786_v43, %v724_v35 }
 0x137   : > { %v800_v1 = vadd.f32 %v796_v13, %v734_v29  ;;  %v735_v4 = vadd.f32 %v3401_v9, %v685_v2  ;;  %vm887_vm3 = vcmp.lt.s32.totalorder %v3402_v22, 128  ;;  %v810_v33 = vadd.f32 %v806_v6, %v744_v50  ;;  %v890_v2 = vpop.permute.xlu0 %889  ;;  %v3409_v29 = vld [vmem:[#allocation79_spill] sm:$0xff] }
 0x138   : > { %v820_v12 = vadd.f32 %v816_v27, %v754_v32  ;;  %v771_v45 = vsel %vm759_vm2, %v766_v21, 0.0  ;;  %v831_v10 = vsel %vm759_vm2, %v824_v40, 0.0  ;;  %v745_v52 = vadd.f32 %v3403_v56, %v695_v58  ;;  %v3405_v40 = vld [vmem:[#allocation74_spill] sm:$0xff] }
 0x139   : > { %v777_v62 = vmul.f32 %v3381_v3, %v771_v45  ;;  %v787_v18 = vmul.f32 %v3382_v20, %v771_v45  ;;  %v797_v24 = vmul.f32 %v3384_v34, %v771_v45  ;;  %v807_v55 = vmul.f32 %v3385_v47, %v771_v45  ;;  %v3406_v3 = vld [vmem:[#allocation76_spill] sm:$0xff]  ;;  %v3407_v20 = vld [vmem:[#allocation77_spill] sm:$0xff]  ;;  %v896_v27 = vpop.permute.xlu1 %895 }
 0x13a   : > { %v817_v53 = vmul.f32 %v3386_v42, %v771_v45  ;;  %v837_v44 = vmul.f32 %v3404_v5, %v831_v10  ;;  %v834_v21 = vsel %vm759_vm2, %v830_v39, 0.0  ;;  %v755_v60 = vadd.f32 %v3405_v40, %v705_v0 }
 0x13b   : > { %v847_v63 = vmul.f32 %v3406_v3, %v831_v10  ;;  %v857_v19 = vmul.f32 %v3407_v20, %v831_v10  ;;  %v832_v34 = vsel %vm759_vm2, %v826_v41, 0.0  ;;  %v781_v47 = vadd.f32 %v777_v62, %v715_v17  ;;  %v892_v7 = vpop.permute.xlu0 %891 }
 0x13c   : > { %v791_v16 = vadd.f32 %v787_v18, %v725_v37  ;;  %v801_v35 = vadd.f32 %v797_v24, %v735_v4  ;;  %v811_v58 = vadd.f32 %v807_v55, %v745_v52  ;;  %v867_v42 = vmul.f32 %v3408_v25, %v831_v10 }
 0x13d   : > { %v877_v30 = vmul.f32 %v3409_v29, %v831_v10  ;;  %v840_v50 = vmul.f32 %v3404_v5, %v834_v21  ;;  %v850_v31 = vmul.f32 %v3406_v3, %v834_v21  ;;  %v821_v0 = vadd.f32 %v817_v53, %v755_v60  ;;  %v894_v56 = vpop.permute.xlu1 %893  ;;  %v3412_v60 = vld [vmem:[#allocation83_spill] sm:$0xff] }
 0x13e   : > { %v841_v32 = vadd.f32 %v837_v44, %v2860_v57  ;;  %v860_v39 = vmul.f32 %v3407_v20, %v834_v21  ;;  %v870_v48 = vmul.f32 %v3408_v25, %v834_v21  ;;  %v851_v41 = vadd.f32 %v847_v63, %v2862_v14 }
 0x13f   : > { %v861_v43 = vadd.f32 %v857_v19, %v2866_v51  ;;  %v880_v13 = vmul.f32 %v3409_v29, %v834_v21  ;;  %v838_v6 = vmul.f32 %v3404_v5, %v832_v34  ;;  %v871_v17 = vadd.f32 %v867_v42, %v2868_v15  ;;  %v952_v52 = vpop.permute.xlu0 %951  ;;  %v3411_v21 = vld [vmem:[#allocation82_spill] sm:$0xff] }
 0x140   : > { %v881_v46 = vadd.f32 %v877_v30, %v2870_v61  ;;  %v844_v37 = vadd.f32 %v840_v50, %v782_v38  ;;  %v854_v57 = vadd.f32 %v850_v31, %v792_v8  ;;  %v864_v9 = vadd.f32 %v860_v39, %v802_v23 }
 0x141   : > { %v874_v4 = vadd.f32 %v870_v48, %v812_v28  ;;  %v848_v45 = vmul.f32 %v3406_v3, %v832_v34  ;;  %v858_v14 = vmul.f32 %v3407_v20, %v832_v34  ;;  %v868_v51 = vmul.f32 %v3408_v25, %v832_v34 }
 0x142   : > { %v878_v10 = vmul.f32 %v3409_v29, %v832_v34  ;;  %v833_v62 = vsel %vm759_vm2, %v828_v54, 0.0  ;;  %v897_v15 = vsel %vm887_vm3, %v890_v2, 0.0  ;;  %v884_v18 = vadd.f32 %v880_v13, %v822_v26  ;;  %v3410_v26 = vld [vmem:[#allocation81_spill] sm:$0xff]  ;;  %v3413_v34 = vld [vmem:[#allocation84_spill] sm:$0xff] }
 0x143   : > { %v842_v61 = vadd.f32 %v838_v6, %v780_v36  ;;  %v900_v38 = vsel %vm887_vm3, %v896_v27, 0.0  ;;  %v898_v8 = vsel %vm887_vm3, %v892_v7, 0.0  ;;  %v839_v23 = vmul.f32 %v3404_v5, %v833_v62  ;;  %v958_v6 = vpop.permute.xlu1 %957  ;;  %v954_v27 = vpop.permute.xlu0 %953 }
 0x144   : > { %v849_v28 = vmul.f32 %v3406_v3, %v833_v62  ;;  %v859_v24 = vmul.f32 %v3407_v20, %v833_v62  ;;  %v869_v59 = vmul.f32 %v3408_v25, %v833_v62  ;;  %v852_v55 = vadd.f32 %v848_v45, %v790_v11 }
 0x145   : > { %v862_v54 = vadd.f32 %v858_v14, %v800_v1  ;;  %v879_v2 = vmul.f32 %v3409_v29, %v833_v62  ;;  %v903_v36 = vmul.f32 %v3410_v26, %v897_v15  ;;  %v872_v53 = vadd.f32 %v868_v51, %v810_v33  ;;  %v3414_v1 = vld [vmem:[#allocation85_spill] sm:$0xff] }
 0x146   : > { %v882_v44 = vadd.f32 %v878_v10, %v820_v12  ;;  %v913_v40 = vmul.f32 %v3411_v21, %v897_v15  ;;  %v923_v5 = vmul.f32 %v3412_v60, %v897_v15  ;;  %v843_v63 = vadd.f32 %v839_v23, %v781_v47 }
 0x147   : > { %v853_v3 = vadd.f32 %v849_v28, %v791_v16  ;;  %v863_v19 = vadd.f32 %v859_v24, %v801_v35  ;;  %v2947_v20 = vadd.f32 %v869_v59, %v811_v58  ;;  %v933_v11 = vmul.f32 %v3413_v34, %v897_v15  ;;  %v3418_v28 = vld [vmem:[#allocation87_spill] sm:$0xff]  ;;  %v3419_v59 = vld [vmem:[#allocation92_spill] sm:$0xff] }
 0x148   : > { %v943_v25 = vmul.f32 %v3414_v1, %v897_v15  ;;  %v906_v42 = vmul.f32 %v3410_v26, %v900_v38  ;;  %v916_v29 = vmul.f32 %v3411_v21, %v900_v38  ;;  %v2953_v30 = vadd.f32 %v879_v2, %v821_v0 }
 0x149   : > { %v907_v33 = vadd.f32 %v903_v36, %v841_v32  ;;  %v926_v12 = vmul.f32 %v3412_v60, %v900_v38  ;;  %v936_v50 = vmul.f32 %v3413_v34, %v900_v38  ;;  %v917_v47 = vadd.f32 %v913_v40, %v851_v41  ;;  %v3421_v40 = vld [vmem:[#allocation89_spill] sm:$0xff] }
 0x14a   : > { %v927_v16 = vadd.f32 %v923_v5, %v861_v43  ;;  %v946_v35 = vmul.f32 %v3414_v1, %v900_v38  ;;  %v904_v58 = vmul.f32 %v3410_v26, %v898_v8  ;;  %v937_v31 = vadd.f32 %v933_v11, %v871_v17  ;;  %v3416_v38 = vld [vmem:[#allocation91_spill] sm:$0xff]  ;;  %v3422_v5 = vld [vmem:[#allocation90_spill] sm:$0xff] }
 0x14b   : > { %v947_v39 = vadd.f32 %v943_v25, %v881_v46  ;;  %v910_v48 = vadd.f32 %v906_v42, %v844_v37  ;;  %v920_v13 = vadd.f32 %v916_v29, %v854_v57  ;;  %v2959_v7 = vadd.f32 %v926_v12, %v864_v9  ;;  %v3415_v57 = vld [vmem:[#allocation34_spill] sm:$0xff] }
 0x14c   : > { %v914_v0 = vmul.f32 %v3411_v21, %v898_v8  ;;  %v924_v32 = vmul.f32 %v3412_v60, %v898_v8  ;;  %v934_v45 = vmul.f32 %v3413_v34, %v898_v8  ;;  %v940_v41 = vadd.f32 %v936_v50, %v874_v4 }
 0x14d   : > { %v944_v43 = vmul.f32 %v3414_v1, %v898_v8  ;;  %v899_v14 = vsel %vm887_vm3, %v894_v56, 0.0  ;;  %v959_v17 = vsel %vm887_vm3, %v952_v52, 0.0  ;;  %v950_v46 = vadd.f32 %v946_v35, %v884_v18  ;;  %v3417_v8 = vld [vmem:[#allocation86_spill] sm:$0xff] }
 0x14e   : > { %v908_v37 = vadd.f32 %v904_v58, %v842_v61  ;;  %vm1022_vm4 = vcmp.lt.s32.totalorder %v3415_v57, 2  ;;  %vm1055_vm5 = vcmp.lt.s32.totalorder %v3415_v57, 1  ;;  %v962_v9 = vsel %vm887_vm3, %v958_v6, 0.0 }
 0x14f   : > { %v960_v4 = vsel %vm887_vm3, %v954_v27, 0.0  ;;  %v918_v51 = vadd.f32 %v914_v0, %v852_v55  ;;  %v928_v10 = vadd.f32 %v924_v32, %v862_v54  ;;  %v905_v62 = vmul.f32 %v3410_v26, %v899_v14  ;;  %v3420_v26 = vld [vmem:[#allocation88_spill] sm:$0xff] }
 0x150   : > { %v915_v15 = vmul.f32 %v3411_v21, %v899_v14  ;;  %vm1031_vm6 = vcmp.ge.s32.totalorder %v3416_v38, 0  ;;  %vm1088_vm7 = vcmp.lt.s32.totalorder %v3415_v57, 7  ;;  %v938_v18 = vadd.f32 %v934_v45, %v872_v53 }
 0x151   : > { %v925_v61 = vmul.f32 %v3412_v60, %v899_v14  ;;  %v965_v23 = vmul.f32 %v3417_v8, %v959_v17  ;;  %v975_v24 = vmul.f32 %v3418_v28, %v959_v17  ;;  %vm1064_vm8 = vcmp.ge.s32.totalorder %v3419_v59, 0 }
 0x152   : > { %v948_v2 = vadd.f32 %v944_v43, %v882_v44  ;;  %v935_v55 = vmul.f32 %v3413_v34, %v899_v14  ;;  %v2985_v54 = vmul.f32 %v3414_v1, %v899_v14  ;;  %v985_v36 = vmul.f32 %v3420_v26, %v959_v17 }
 0x153   : > { %vm1121_vm9 = vcmp.lt.s32.totalorder %v3415_v57, 6  ;;  %v909_v56 = vadd.f32 %v905_v62, %v843_v63  ;;  %v2989_v52 = vadd.f32 %v915_v15, %v853_v3  ;;  %v969_v53 = vadd.f32 %v965_v23, %v907_v33 }
 0x154   : > { %v979_v21 = vadd.f32 %v975_v24, %v917_v47  ;;  %v995_v60 = vmul.f32 %v3421_v40, %v959_v17  ;;  %v1005_v11 = vmul.f32 %v3422_v5, %v959_v17  ;;  %v968_v44 = vmul.f32 %v3417_v8, %v962_v9 }
 0x155   : > { %v978_v34 = vmul.f32 %v3418_v28, %v962_v9  ;;  %v2995_v25 = vadd.f32 %v925_v61, %v863_v19  ;;  %v1018_v1 = vrot.slane %v969_v53, 6  ;;  %v998_v29 = vmul.f32 %v3421_v40, %v962_v9 }
 0x156   : > { %v1051_v42 = vrot.slane %v979_v21, 7  ;;  %v999_v12 = vadd.f32 %v995_v60, %v937_v31  ;;  %v1009_v63 = vadd.f32 %v1005_v11, %v947_v39  ;;  %v2998_v3 = vadd.f32 %v968_v44, %v910_v48 }
 0x157   : > { %v3000_v33 = vadd.f32 %v978_v34, %v920_v13  ;;  %v989_v50 = vadd.f32 %v985_v36, %v927_v16  ;;  %v3002_v47 = vadd.f32 %v998_v29, %v940_v41  ;;  %v1008_v35 = vmul.f32 %v3422_v5, %v962_v9  ;;  %v3423_v36 = vld [vmem:[#allocation93_spill] sm:$0xff] }
 0x158   : > { %v966_v58 = vmul.f32 %v3417_v8, %v960_v4  ;;  %v1084_v6 = vrot.slane %v999_v12, 1  ;;  %v1117_v19 = vrot.slane %v1009_v63, 2  ;;  %v1021_v27 = vrot.slane %v2998_v3, 6 }
 0x159   : > { %v1054_v0 = vrot.slane %v3000_v33, 7  ;;  %v3008_v32 = vadd.f32 %v1008_v35, %v950_v46  ;;  %v1087_v31 = vrot.slane %v3002_v47, 1  ;;  %v976_v48 = vmul.f32 %v3418_v28, %v960_v4 }
 0x15a   : > { %v970_v39 = vadd.f32 %v966_v58, %v908_v37  ;;  %v1026_v16 = vsel %vm1022_vm4, %v1021_v27, %v1018_v1  ;;  %v986_v45 = vmul.f32 %v3420_v26, %v960_v4  ;;  %v996_v41 = vmul.f32 %v3421_v40, %v960_v4  ;;  %v956_v37 = vpop.permute.xlu1 %955 }
 0x15b   : > { %v1059_v13 = vsel %vm1055_vm5, %v1054_v0, %v1051_v42  ;;  %v939_v43 = vadd.f32 %v935_v55, %v2947_v20  ;;  %v1043_v14 = vsel %vm1031_vm6, %v1026_v16, 0.0  ;;  %v1092_v17 = vsel %vm1088_vm7, %v1087_v31, %v1084_v6 }
 0x15c   : > { %v1120_v46 = vrot.slane %v3008_v32, 2  ;;  %v988_v62 = vmul.f32 %v3420_v26, %v962_v9  ;;  %v1047_v15 = vadd.f32 %v1043_v14, %v989_v50  ;;  %v1076_v61 = vsel %vm1064_vm8, %v1059_v13, 0.0 }
 0x15d   : > { %v980_v23 = vadd.f32 %v976_v48, %v918_v51  ;;  %v1000_v20 = vadd.f32 %v996_v41, %v938_v18  ;;  %v1006_v38 = vmul.f32 %v3422_v5, %v960_v4  ;;  %v1019_v55 = vrot.slane %v970_v39, 6 }
 0x15e   : > { %v1125_v24 = vsel %vm1121_vm9, %v1120_v46, %v1117_v19  ;;  %vm1104_vm10 = vcmp.lt.s32.totalorder %v3423_v36, 32  ;;  %v1080_v53 = vadd.f32 %v1076_v61, %v1047_v15  ;;  %v990_v21 = vadd.f32 %v986_v45, %v928_v10 }
 0x15f   : > { %v1052_v60 = vrot.slane %v980_v23, 7  ;;  %v961_v9 = vsel %vm887_vm3, %v956_v37, 0.0  ;;  %v1010_v11 = vadd.f32 %v1006_v38, %v948_v2  ;;  %v1025_v59 = vsel %vm1022_vm4, %v1018_v1, %v1019_v55 }
 0x160   : > { %v1085_v51 = vrot.slane %v1000_v20, 1  ;;  %v967_v44 = vmul.f32 %v3417_v8, %v961_v9  ;;  %vm1137_vm11 = vcmp.lt.s32.totalorder %v2726_v49, 32  ;;  %v1048_v18 = vadd.f32 %v1025_v59, %v990_v21 }
 0x161   : > { %v1058_v4 = vsel %vm1055_vm5, %v1051_v42, %v1052_v60  ;;  %v977_v34 = vmul.f32 %v3418_v28, %v961_v9  ;;  %v987_v10 = vmul.f32 %v3420_v26, %v961_v9  ;;  %v1118_v2 = vrot.slane %v1010_v11, 2 }
 0x162   : > { %v1091_v22 = vsel %vm1088_vm7, %v1084_v6, %v1085_v51  ;;  %v971_v29 = vadd.f32 %v967_v44, %v909_v56  ;;  %v997_v1 = vmul.f32 %v3421_v40, %v961_v9  ;;  %v949_v8 = vadd.f32 %v2985_v54, %v2953_v30 }
 0x163   : > { %v1081_v12 = vadd.f32 %v1058_v4, %v1048_v18  ;;  %v1113_v63 = vadd.f32 %v1091_v22, %v1080_v53  ;;  %v981_v3 = vadd.f32 %v977_v34, %v2989_v52  ;;  %v1124_v42 = vsel %vm1121_vm9, %v1117_v19, %v1118_v2 }
 0x164   : > { %v1001_v28 = vadd.f32 %v997_v1, %v939_v43  ;;  %v1007_v26 = vmul.f32 %v3422_v5, %v961_v9  ;;  %v1020_v33 = vrot.slane %v971_v29, 6  ;;  %v992_v50 = vadd.f32 %v988_v62, %v2959_v7 }
 0x165   : > { %v1146_v47 = vadd.f32 %v1124_v42, %v1113_v63  ;;  %v991_v56 = vadd.f32 %v987_v10, %v2995_v25  ;;  %v1053_v40 = vrot.slane %v981_v3, 7  ;;  %v1112_v45 = vsel %vm1104_vm10, %v1092_v17, 0.0 }
 0x166   : > { %v1011_v35 = vadd.f32 %v1007_v26, %v949_v8  ;;  %v1023_v30 = vsel %vm1022_vm4, %v1020_v33, %v1021_v27  ;;  %v1024_v54 = vsel %vm1022_vm4, %v1019_v55, %v1020_v33  ;;  %v1086_v52 = vrot.slane %v1001_v28, 1 }
 0x167   : > { %v1150_v58 = vsub.f32 0.0, %v1146_v47  ;;  %v1049_v6 = vadd.f32 %v1024_v54, %v991_v56  ;;  %v1050_v19 = vadd.f32 %v1023_v30, %v992_v50  ;;  %v1056_v5 = vsel %vm1055_vm5, %v1053_v40, %v1054_v0 }
 0x168   : > { %v1057_v7 = vsel %vm1055_vm5, %v1052_v60, %v1053_v40  ;;  %v1089_v25 = vsel %vm1088_vm7, %v1086_v52, %v1087_v31  ;;  %v1090_v32 = vsel %vm1088_vm7, %v1085_v51, %v1086_v52  ;;  %v1119_v27 = vrot.slane %v1011_v35, 2 }
 0x169   : > { %v1154_v39 = vmul.f32 1.442695, %v1150_v58  ;;  %v1082_v48 = vadd.f32 %v1057_v7, %v1049_v6  ;;  %v1083_v16 = vadd.f32 %v1056_v5, %v1050_v19  ;;  %v1114_v13 = vadd.f32 %v1090_v32, %v1081_v12 }
 0x16a   : > { %v1122_v0 = vsel %vm1121_vm9, %v1119_v27, %v1120_v46  ;;  %v1123_v41 = vsel %vm1121_vm9, %v1118_v2, %v1119_v27  ;;  %v1145_v37 = vsel %vm1137_vm11, %v1125_v24, 0.0 }
 0x16b   : > { %1677 = vpow2.f32 %v1154_v39  ;;  %v1115_v43 = vadd.f32 %v1089_v25, %v1082_v48  ;;  %v1116_v31 = vadd.f32 %v1112_v45, %v1083_v16  ;;  %v1147_v14 = vadd.f32 %v1123_v41, %v1114_v13 }
 0x16d   : > { %v1148_v62 = vadd.f32 %v1122_v0, %v1115_v43  ;;  %v1149_v15 = vadd.f32 %v1145_v37, %v1116_v31  ;;  %v1151_v61 = vsub.f32 0.0, %v1147_v14 }
 0x16f   : > { %v1152_v23 = vsub.f32 0.0, %v1148_v62  ;;  %v1153_v20 = vsub.f32 0.0, %v1149_v15  ;;  %v1156_v38 = vmul.f32 1.442695, %v1151_v61 }
 0x171   : > { %1679 = vpow2.f32 %v1156_v38  ;;  %v1158_v17 = vmul.f32 1.442695, %v1152_v23  ;;  %v1160_v55 = vmul.f32 1.442695, %v1153_v20 }
 0x173   : > { %1681 = vpow2.f32 %v1158_v17 }
 0x174   : > { %1683 = vpow2.f32 %v1160_v55 }
 0x178   : > { %v1678_v57 = vpop.eup %1677 }
 0x179   : > { %v1162_v46 = vadd.f32 1.0, %v1678_v57 }
 0x17b   : > { %1685 = vrcp.f32 %v1162_v46 }
 0x17e   : > { %v1680_v36 = vpop.eup %1679 }
 0x17f   : > { %v1163_v53 = vadd.f32 1.0, %v1680_v36 }
 0x180   : > { %v1682_v21 = vpop.eup %1681 }
 0x181   : > { %v1684_v60 = vpop.eup %1683  ;;  %v1164_v49 = vadd.f32 1.0, %v1682_v21  ;;  %1687 = vrcp.f32 %v1163_v53 }
 0x182   : > { %v1165_v24 = vadd.f32 1.0, %v1684_v60 }
 0x183   : > { %1689 = vrcp.f32 %v1164_v49 }
 0x184   : > { %1691 = vrcp.f32 %v1165_v24 }
 0x188   : > { %v1686_v9 = vpop.eup %1685 }
 0x189   : > { %1174 = vst [vmem:[#allocation2] sm:$0xff] %v1686_v9 }
 0x18e   : > { %v1688_v11 = vpop.eup %1687 }
 0x18f   : > { %1175 = vst [vmem:[#allocation2 + $0x8] sm:$0xff] %v1688_v11 }
 0x190   : > { %v1690_v59 = vpop.eup %1689 }
 0x191   : > { %v1692_v51 = vpop.eup %1691  ;;  %1176 = vst [vmem:[#allocation2 + $0x10] sm:$0xff] %v1690_v59 }
 0x192   : > { %1177 = vst [vmem:[#allocation2 + $0x18] sm:$0xff] %v1692_v51 }
 0x193 PF: > { %s3424_s11 = sld [smem:[#allocation17_spill]]  ;;  %s3075_s3 = smov 0  }
 0x199   : > { %s1462_s16 = sshll.u32 %s3424_s11, 3 }
 0x19a   : > { %s1179_s26 = scalar_lea.vmem [#allocation2], %s1462_s16 }
 0x19b   : > { %v1180_v44 = vld [vmem:[%s1179_s26] sm:$0xff] }
 0x19c LB: >> { %s3426_s25 = sld [smem:[#allocation28_spill]]  ;;  %s1473_s30 = sshll.u32 %s1940_s3, 9  ;;  %s1940_s3 = sphi %s3075_s3, %s1186_s3  }
 0x19d   : >> { %s3427_s4 = sld [smem:[#allocation29_spill]]  ;;  %s1474_s21 = sshll.u32 %s1940_s3, 7 }
 0x19e   : >> { %s1189_s29 = sadd.s32 %s1473_s30, %s1462_s16  ;;  %s1186_s3 = sadd.s32 1, %s1940_s3  }
 0x19f   : >> { %p1183_p10 = scmp.ge.s32.totalorder %s1186_s3, 4  }
 0x1a0   : > { %s3429_s0 = sld [smem:[#allocation18_spill]] (%p1183_p10)  ;;  %s1950_s15 = smov (%p1183_p10), [#allocation8]  }
 0x1a1   : > { %s3430_s9 = sld [smem:[#allocation17_spill]] (%p1183_p10)  ;;  %s1740_s11 = sshll.u32 (%p1183_p10), %s1950_s15, 4  ;;  %s1741_s11 = int_to_ptr.vmem [resolvable:$false] %s1740_s11 }
 0x1a2   : >> { %s3085_s5 = scalar_lea.vmem %s3426_s25, %s1189_s29  ;;  %s3431_s27 = sld [smem:[#allocation29_spill]] (%p1183_p10) }
 0x1a3   : >> { %v1191_v18 = vld [vmem:[%s3085_s5] sm:$0xff]  ;;  %s3428_s24 = scalar_lea.vmem [#allocation8], %s3427_s4  ;;  %s3432_s12 = sld [smem:[#allocation13_spill]] (%p1183_p10) }
 0x1a4   : >> { %s3090_s6 = scalar_lea.vmem %s3428_s24, %s1474_s21 [#allocation8]  ;;  %v1192_v4 = vld [vmem:[%s3085_s5 + $0x20] sm:$0xff]  ;;  %v1207_v10 = vmul.f32 %v1191_v18, %v1180_v44  ;;  %s3433_s20 = sld [smem:[#allocation22_spill]] (%p1183_p10) }
 0x1a5   : >> { %v1193_v34 = vld [vmem:[%s3085_s5 + $0x40] sm:$0xff]  ;;  %v1208_v22 = vmul.f32 %v1192_v4, %v1180_v44  ;;  %s3435_s7 = sld [smem:[#allocation96_spill]] (%p1183_p10)  ;;  %s1742_s16 = scalar_lea.vmem (%p1183_p10), %s1741_s11, 16384 }
 0x1a6   : >> { %v1209_v2 = vmul.f32 %v1193_v34, %v1180_v44  ;;  %v1194_v29 = vld [vmem:[%s3085_s5 + $0x60] sm:$0xff]  ;;  %1225 = vst [vmem:[%s3090_s6] sm:$0xff] %v1207_v10  ;;  %s1467_s1 = sshll.u32 (%p1183_p10), %s3429_s0, 8 }
 0x1a7   : >> { %v1195_v1 = vld [vmem:[%s3085_s5 + $0x80] sm:$0xff]  ;;  %v1210_v12 = vmul.f32 %v1194_v29, %v1180_v44  ;;  %1226 = vst [vmem:[%s3090_s6 + $0x8] sm:$0xff] %v1208_v22  ;;  %s1253_s14 = sadd.s32 (%p1183_p10), %s3430_s9, %s1467_s1 }
 0x1a8   : >> { %v1196_v8 = vld [vmem:[%s3085_s5 + $0xa0] sm:$0xff]  ;;  %v1211_v63 = vmul.f32 %v1195_v1, %v1180_v44  ;;  %1227 = vst [vmem:[%s3090_s6 + $0x10] sm:$0xff] %v1209_v2  ;;  %s3434_s13 = scalar_lea.vmem (%p1183_p10), [#allocation8], %s3431_s27  ;;  %s1468_s2 = sshll.u32 (%p1183_p10), %s1253_s14, 7 }
 0x1a9   : >> { %v1212_v3 = vmul.f32 %v1196_v8, %v1180_v44  ;;  %v1197_v42 = vld [vmem:[%s3085_s5 + $0xc0] sm:$0xff]  ;;  %1228 = vst [vmem:[%s3090_s6 + $0x18] sm:$0xff] %v1210_v12  ;;  %s1256_s17 = sshll.u32 (%p1183_p10), %s3434_s13, 4  ;;  %s3436_s8 = sand.u32 (%p1183_p10), 1, %s3432_s12   ;;  %s3130_s17 = int_to_ptr.vmem [resolvable:$true] %s1256_s17 }
 0x1aa   : >> { %v1198_v28 = vld [vmem:[%s3085_s5 + $0xe0] sm:$0xff]  ;;  %v1213_v33 = vmul.f32 %v1197_v42, %v1180_v44  ;;  %1229 = vst [vmem:[%s3090_s6 + $0x20] sm:$0xff] %v1211_v63  ;;  %s3139_s28 = scalar_lea.sflag (%p1183_p10), [#allocation5], %s3436_s8  ;;  %s1736_s22 = scalar_lea.vmem (%p1183_p10), %s3130_s17, 8192 }
 0x1ab   : >> { %v1199_v26 = vld [vmem:[%s3085_s5 + $0x100] sm:$0xff]  ;;  %v1214_v50 = vmul.f32 %v1198_v28, %v1180_v44  ;;  %1230 = vst [vmem:[%s3090_s6 + $0x28] sm:$0xff] %v1212_v3  ;;  %s3135_s10 = scalar_lea.hbm (%p1183_p10), %s3435_s7, %s1468_s2  ;;  %p1737_p12 = scmp.ne.s32.totalorder (%p1183_p10), %s3130_s17, %s1736_s22 }
 0x1ac   : >> { %v1215_v47 = vmul.f32 %v1199_v26, %v1180_v44  ;;  %v1200_v56 = vld [vmem:[%s3085_s5 + $0x120] sm:$0xff]  ;;  %1231 = vst [vmem:[%s3090_s6 + $0x30] sm:$0xff] %v1213_v33  ;;  %p3437_p0 = scmp.ne.s32.totalorder (%p1183_p10), %s3433_s20, 0  ;;  %p1743_p5 = scmp.lt.s32.totalorder (%p1183_p10), %s3130_s17, %s1741_s11 }
 0x1ad   : >> { %v1201_v40 = vld [vmem:[%s3085_s5 + $0x140] sm:$0xff]  ;;  %v1216_v30 = vmul.f32 %v1200_v56, %v1180_v44  ;;  %1232 = vst [vmem:[%s3090_s6 + $0x38] sm:$0xff] %v1214_v50  ;;  %p1744_p8 = scmp.lt.s32.totalorder (%p1183_p10), %s1742_s16, %s1736_s22 }
 0x1ae   : >> { %v1202_v35 = vld [vmem:[%s3085_s5 + $0x160] sm:$0xff]  ;;  %v1217_v54 = vmul.f32 %v1201_v40, %v1180_v44  ;;  %1233 = vst [vmem:[%s3090_s6 + $0x40] sm:$0xff] %v1215_v47  ;;  %p1738_p1 = pnand (%p1183_p10), %p1737_p12, %p3437_p0 }
 0x1af   : >> { %v1218_v52 = vmul.f32 %v1202_v35, %v1180_v44  ;;  %v1203_v58 = vld [vmem:[%s3085_s5 + $0x180] sm:$0xff]  ;;  %1234 = vst [vmem:[%s3090_s6 + $0x48] sm:$0xff] %v1216_v30  ;;  %p1745_p9 = por (%p1183_p10), %p1744_p8, %p1743_p5 }
 0x1b0   : >> { %v1204_v6 = vld [vmem:[%s3085_s5 + $0x1a0] sm:$0xff]  ;;  %v1219_v5 = vmul.f32 %v1203_v58, %v1180_v44  ;;  %1235 = vst [vmem:[%s3090_s6 + $0x50] sm:$0xff] %v1217_v54  ;;  %p1739_p2 = pneg (%p1183_p10), %p1738_p1 }
 0x1b1   : >> { %v1205_v19 = vld [vmem:[%s3085_s5 + $0x1c0] sm:$0xff]  ;;  %v1220_v7 = vmul.f32 %v1204_v6, %v1180_v44  ;;  %1236 = vst [vmem:[%s3090_s6 + $0x58] sm:$0xff] %v1218_v52  ;;  %1185 = sbr.rel (!%p1183_p10) target bundleno = 412 (0x19c), region = 111 }
 0x1b2   : >> { %v1221_v25 = vmul.f32 %v1205_v19, %v1180_v44  ;;  %v1206_v32 = vld [vmem:[%s3085_s5 + $0x1e0] sm:$0xff]  ;;  %1237 = vst [vmem:[%s3090_s6 + $0x60] sm:$0xff] %v1219_v5  ;;  %p1746_p11 = pnand (%p1183_p10), %p1745_p9, %p1739_p2 }
 0x1b3   : >> { %v1222_v27 = vmul.f32 %v1206_v32, %v1180_v44  ;;  %1238 = vst [vmem:[%s3090_s6 + $0x68] sm:$0xff] %v1220_v7 }
 0x1b4   : >> { %1239 = vst [vmem:[%s3090_s6 + $0x70] sm:$0xff] %v1221_v25 }
 0x1b5   : >> { %1240 = vst [vmem:[%s3090_s6 + $0x78] sm:$0xff] %v1222_v27 }
 0x1b6   : > { %1749 = shalt.err (!%p1746_p11)
}
 0x1b7   : > { %s1750_s26 = scalar_lea.hbm %s3135_s10, 8192  ;;  %s1754_s25 = scalar_lea.hbm %s3435_s7, 65536 }
 0x1b8   : > { %p1751_p13 = scmp.ne.s32.totalorder %s3135_s10, %s1750_s26  ;;  %p1755_p3 = scmp.lt.s32.totalorder %s3135_s10, %s3435_s7 }
 0x1b9   : > { %p1756_p7 = scmp.lt.s32.totalorder %s1754_s25, %s1750_s26 }
 0x1ba   : > { %p1752_p4 = pnand %p1751_p13, %p3437_p0 }
 0x1bb   : > { %p1757_p10 = por %p1756_p7, %p1755_p3 }
 0x1bc   : > { %p1753_p6 = pneg %p1752_p4 }
 0x1be   : > { %p1758_p12 = pnand %p1757_p10, %p1753_p6 }
 0x1c0   : > { %1761 = shalt.err (!%p1758_p12)
}
 0x1c1   : > { %s1951_s21 = smov 128   ;;  %s1952_s29 = smov 512  }
 0x1c2   : > { %s1953_s5 = smov 8  }
 0x1c3   : > { %1481 = dma.vmem_to_hbm [thread:$0]  (%p3437_p0), %s3130_s17, 8192, %s3135_s10, %s3139_s28, %s1951_s21, %s1952_s29, %s1953_s5  }
 0x1c4 PF: > { %s3438_s24 = sld [smem:[#allocation21_spill]] }
 0x1c5   : > { %s3439_s6 = sld [smem:[#allocation12_spill]] }
 0x1c6   : > { %s3440_s0 = sld [smem:[#allocation23_spill]] }
 0x1ca   : > { %p1498_p1 = scmp.ge.s32.totalorder %s3438_s24, 2 }
 0x1cb   : > { %s1271_s9 = sand.u32 1, %s3439_s6  }
 0x1cc   : > { %p3441_p2 = scmp.ne.s32.totalorder %s3440_s0, 0  ;;  %s1272_s27 = scalar_lea.sflag [#allocation5], %s1271_s9 }
 0x1ce   : > { %p1492_p5 = pnand %p1498_p1, %p3441_p2 }
 0x1d0   : > { %p1493_p8 = pneg %p1492_p5 }
 0x1d2   : > { %1855 = dma.done.wait (%p1493_p8), %s1272_s27, 8192  }
 0x1d3   : > { %1857 = vsyncadd (%p1493_p8), %s1272_s27, 4294959104  ;;  %s19_s19 = sadd.s32 1, %s3438_s24   ;;  %s3442_s9 = sld [smem:[#allocation13_spill]] }
 0x1d4   : > { %p16_p9 = scmp.ge.s32.totalorder %s19_s19, 10   ;;  %s3443_s10 = sld [smem:[#allocation14_spill]] }
 0x1d5   : > { %s3444_s11 = sld [smem:[#allocation27_spill]] }
 0x1d6   : > { %s3445_s12 = sld [smem:[#allocation15_spill]] }
 0x1d7   : > { %s3446_s13 = sld [smem:[#allocation16_spill]] }
 0x1d8   : > { %s3447_s14 = sld [smem:[#allocation26_spill]]  ;;  %18 = sbr.rel (!%p16_p9) target bundleno = 14 (0xe), region = 122 }
 0x1d9   : > { %s3448_s15 = sld [smem:[#allocation19_spill]] }
 0x1da   : > { %s3449_s16 = sld [smem:[#allocation20_spill]] }
 0x1db   : > { %s3450_s17 = sld [smem:[#allocation24_spill]] }
 0x1dc   : > { %s3451_s18 = sld [smem:[#allocation25_spill]] }
 0x1dd   :  { %1277 = vsyncpa [#allocation4], 1 }
 0x1de   :  { %1279 = vsyncpa [#allocation4 + $0x1], 1 }
 0x1df   :  { %1280 = vsyncpa [#allocation5], 1 }
 0x1e0   :  { %1282 = vsyncpa [#allocation5 + $0x1], 1 }
 0x1e1   :  { %1283 = vsyncpa [#allocation6], 1 }
 0x1e2   :  { %1285 = vsyncpa [#allocation6 + $0x1], 1 }

</bundles_post_ra>
